<compile_context>
chip_gen: v5e
topology: v5e:2x2
jax: 0.10.0
libtpu: 0.0.40
codegen_flags: <defaults>
</compile_context>

<pallas_src>
import functools

import jax
import jax.numpy as jnp
from jax.experimental import pallas as pl
from jax.experimental.pallas import tpu as pltpu

# ----------------------------------------------------------------------------
# "settings" used by the original torch module (fixed deterministically here).
# ----------------------------------------------------------------------------
SIZE_HIDDEN_1 = 32
SIZE_HIDDEN_2 = 32
ABSOLUTE_DURATION = 16          # T (number of simulated time steps)
DELTA_T = 1
TAU_V = 20
TAU_I = 5
V_THRESHOLD = 0.5

_SUBLANES = 8                   # f32 sublane tile height


# ----------------------------------------------------------------------------
# LIF recurrence helpers (run on values that are already in vregs / VMEM).
# ----------------------------------------------------------------------------
def _lif_step(v, i, cur_t, *, decay_v, decay_i, v_th):
    """One current-LIF step (pure VPU). Matches the torch update order."""
    v = decay_v * v
    i = decay_i * i
    i = i + cur_t
    v = v + i
    # spike = step(v - v_threshold), strict '>' ; single compare reused for reset.
    spk = jnp.where(v > v_th, 1.0, 0.0)
    v = v * (1.0 - spk)          # reset-to-zero where it spiked (after recording)
    return v, i, spk


def _lif_scan_record(cur, spk_ref, *, T, BP, decay_v, decay_i, v_th):
    """T unrolled LIF steps over pre-computed currents cur (T*BP, D); record spikes."""
    D = cur.shape[-1]
    v = jnp.zeros((BP, D), jnp.float32)
    i = jnp.zeros((BP, D), jnp.float32)
    for t in range(T):                                   # static -> fully unrolled
        cur_t = cur[t * BP:(t + 1) * BP, :]              # aligned (BP, D) slice
        v, i, spk = _lif_step(v, i, cur_t,
                              decay_v=decay_v, decay_i=decay_i, v_th=v_th)
        spk_ref[t * BP:(t + 1) * BP, :] = spk            # aligned VMEM store


def _lif_scan_sum(cur, *, T, BP, decay_v, decay_i, v_th):
    """T unrolled LIF steps; return only the per-(batch, feature) spike count."""
    D = cur.shape[-1]
    v = jnp.zeros((BP, D), jnp.float32)
    i = jnp.zeros((BP, D), jnp.float32)
    s = jnp.zeros((BP, D), jnp.float32)
    for t in range(T):
        cur_t = cur[t * BP:(t + 1) * BP, :]
        v, i, spk = _lif_step(v, i, cur_t,
                              decay_v=decay_v, decay_i=decay_i, v_th=v_th)
        s = s + spk
    return s


# ----------------------------------------------------------------------------
# Fused 3-layer SNN kernel.
#   x_ref  : (T*BP, F_in)  bf16  time-major, batch-padded input spike train
#   w*_ref : (F_in, F_out) bf16  layer weights (as consumed by the torch einsum)
#   out_ref: (BP, C)       f32   spike counts of the last layer (== sum over time)
#   spk*_ref: VMEM scratch holding intermediate spike trains (never hits HBM)
# ----------------------------------------------------------------------------
def _snn_fused_kernel(x_ref, w1_ref, w2_ref, w3_ref, out_ref,
                      spk1_ref, spk2_ref, *, T, BP, decay_v, decay_i, v_th):
    lif = dict(T=T, BP=BP, decay_v=decay_v, decay_i=decay_i, v_th=v_th)

    # Layer 1: ONE MXU matmul for all time steps, then an unrolled VPU recurrence.
    cur1 = jnp.dot(x_ref[...], w1_ref[...], preferred_element_type=jnp.float32)
    _lif_scan_record(cur1, spk1_ref, **lif)

    # Layer 2: spikes stay resident in VMEM; 0/1 spikes cast to bf16 is lossless.
    cur2 = jnp.dot(spk1_ref[...].astype(jnp.bfloat16), w2_ref[...],
                   preferred_element_type=jnp.float32)
    _lif_scan_record(cur2, spk2_ref, **lif)

    # Layer 3: no spike train recorded -- only the time-summed spike counts.
    cur3 = jnp.dot(spk2_ref[...].astype(jnp.bfloat16), w3_ref[...],
                   preferred_element_type=jnp.float32)
    out_ref[...] = _lif_scan_sum(cur3, **lif)


def snn_forward(input_spikes_bft: jax.Array, weights):
    """Mirrors SNN.forward: chain of 3 spiking layers, then sum over time.

    input_spikes_bft: (B, F_in, T)  -- same axis convention as the torch module.
    weights: [w1 (F_in, H1), w2 (H1, H2), w3 (H2, nb_classes)]
    returns: (B, nb_classes) float32 spike counts.
    """
    w1, w2, w3 = weights
    B, F_in, T = input_spikes_bft.shape
    H1, H2, C = w1.shape[1], w2.shape[1], w3.shape[1]
    assert w1.shape[0] == F_in and w2.shape[0] == H1 and w3.shape[0] == H2

    # Pad batch to a sublane tile so in-kernel per-step slices/stores are aligned.
    BP = ((B + _SUBLANES - 1) // _SUBLANES) * _SUBLANES

    # One-time layout prep (single small XLA fusion for the whole network):
    # (B, F, T) -> time-major (T, B, F) -> pad batch -> flatten (T*BP, F) -> bf16.
    x = jnp.transpose(input_spikes_bft, (2, 0, 1))
    x = jnp.pad(x, ((0, 0), (0, BP - B), (0, 0)))
    x2d = x.reshape(T * BP, F_in).astype(jnp.bfloat16)

    decay_v = 1.0 - float(int(DELTA_T)) / float(int(TAU_V))
    decay_i = 1.0 - float(int(DELTA_T)) / float(int(TAU_I))

    kernel = functools.partial(
        _snn_fused_kernel,
        T=T, BP=BP, decay_v=decay_v, decay_i=decay_i, v_th=float(V_THRESHOLD))

    out_padded = pl.pallas_call(
        kernel,
        out_shape=jax.ShapeDtypeStruct((BP, C), jnp.float32),
        in_specs=[pl.BlockSpec(memory_space=pltpu.MemorySpace.VMEM)] * 4,
        out_specs=pl.BlockSpec(memory_space=pltpu.MemorySpace.VMEM),
        scratch_shapes=[
            pltpu.VMEM((T * BP, H1), jnp.float32),   # layer-1 spike train
            pltpu.VMEM((T * BP, H2), jnp.float32),   # layer-2 spike train
        ],
    )(
        x2d,
        w1.astype(jnp.bfloat16),
        w2.astype(jnp.bfloat16),
        w3.astype(jnp.bfloat16),
    )
    return out_padded[:B]


if __name__ == "__main__":
    key = jax.random.PRNGKey(0)
    k_x, k_w1, k_w2, k_w3 = jax.random.split(key, 4)

    B = 2
    INPUT_SIZE = 64
    NB_CLASSES = 8
    T = ABSOLUTE_DURATION

    # deterministic binary input spike train, (batch, input_size, time) like torch
    x = jax.random.bernoulli(k_x, 0.3, (B, INPUT_SIZE, T)).astype(jnp.float32)

    # deterministic weights with the shapes the torch module consumes:
    #   fc1.weight: (input_size, size_hidden_1)
    #   fc2.weight: (size_hidden_1, size_hidden_2)
    #   fc3.weight: (size_hidden_2, nb_classes)
    w1 = (jax.random.uniform(k_w1, (INPUT_SIZE, SIZE_HIDDEN_1), jnp.float32, -1.0, 1.0)
          / jnp.sqrt(INPUT_SIZE))
    w2 = (jax.random.uniform(k_w2, (SIZE_HIDDEN_1, SIZE_HIDDEN_2), jnp.float32, -1.0, 1.0)
          / jnp.sqrt(SIZE_HIDDEN_1))
    w3 = (jax.random.uniform(k_w3, (SIZE_HIDDEN_2, NB_CLASSES), jnp.float32, -1.0, 1.0)
          / jnp.sqrt(SIZE_HIDDEN_2))

    fwd = jax.jit(snn_forward)
    out = jax.block_until_ready(fwd(x, [w1, w2, w3]))

    assert out.shape == (B, NB_CLASSES), out.shape
    assert bool(jnp.all(jnp.isfinite(out)))
    # spike counts are bounded by the number of time steps
    assert bool(jnp.all((out >= 0) & (out <= T)))
    print("KERNEL_OK")
</pallas_src>

<mosaic_0001>
module attributes {stable_mosaic.version = 11 : i64} {
  func.func @_snn_fused_kernel(%arg0: memref<128x64xbf16, #tpu.memory_space<vmem>>, %arg1: memref<64x32xbf16, #tpu.memory_space<vmem>>, %arg2: memref<32x32xbf16, #tpu.memory_space<vmem>>, %arg3: memref<32x8xbf16, #tpu.memory_space<vmem>>, %arg4: memref<8x8xf32, #tpu.memory_space<vmem>>, %arg5: memref<128x32xf32, #tpu.memory_space<vmem>>, %arg6: memref<128x32xf32, #tpu.memory_space<vmem>>) attributes {dimension_semantics = [], scalar_prefetch = 0 : i64, scratch_operands = 2 : i64, tpu.core_type = #tpu.core_type<tc>} {
    %c0 = arith.constant 0 : index
    %c0_0 = arith.constant 0 : index
    %0 = vector.load %arg0[%c0, %c0_0] : memref<128x64xbf16, #tpu.memory_space<vmem>>, vector<128x64xbf16>
    %c0_1 = arith.constant 0 : index
    %c0_2 = arith.constant 0 : index
    %1 = vector.load %arg1[%c0_1, %c0_2] : memref<64x32xbf16, #tpu.memory_space<vmem>>, vector<64x32xbf16>
    %cst = arith.constant dense<0.000000e+00> : vector<128x32xf32>
    %2 = tpu.matmul %0, %1, %cst {dimension_numbers = #tpu.dot_dimension_numbers<[1], [0], [0], [1], [0, 0, 1, 1], [], []>} : vector<128x64xbf16>, vector<64x32xbf16>, vector<128x32xf32> -> vector<128x32xf32>
    %cst_3 = arith.constant 0.000000e+00 : f32
    %3 = vector.broadcast %cst_3 : f32 to vector<8x32xf32>
    %cst_4 = arith.constant 0.000000e+00 : f32
    %4 = vector.broadcast %cst_4 : f32 to vector<8x32xf32>
    %5 = vector.extract_strided_slice %2 {offsets = [0, 0], sizes = [8, 32], strides = [1, 1]} : vector<128x32xf32> to vector<8x32xf32>
    %cst_5 = arith.constant 0.949999988 : f32
    %6 = vector.broadcast %cst_5 : f32 to vector<8x32xf32>
    %7 = arith.mulf %6, %3 : vector<8x32xf32>
    %cst_6 = arith.constant 8.000000e-01 : f32
    %8 = vector.broadcast %cst_6 : f32 to vector<8x32xf32>
    %9 = arith.mulf %8, %4 : vector<8x32xf32>
    %10 = arith.addf %9, %5 : vector<8x32xf32>
    %11 = arith.addf %7, %10 : vector<8x32xf32>
    %cst_7 = arith.constant 5.000000e-01 : f32
    %12 = vector.broadcast %cst_7 : f32 to vector<8x32xf32>
    %13 = arith.cmpf ogt, %11, %12 : vector<8x32xf32>
    %cst_8 = arith.constant 1.000000e+00 : f32
    %cst_9 = arith.constant 0.000000e+00 : f32
    %14 = vector.broadcast %cst_8 : f32 to vector<8x32xf32>
    %15 = vector.broadcast %cst_9 : f32 to vector<8x32xf32>
    %16 = arith.select %13, %14, %15 : vector<8x32xi1>, vector<8x32xf32>
    %cst_10 = arith.constant 1.000000e+00 : f32
    %17 = vector.broadcast %cst_10 : f32 to vector<8x32xf32>
    %18 = arith.subf %17, %16 : vector<8x32xf32>
    %19 = arith.mulf %11, %18 : vector<8x32xf32>
    %c0_11 = arith.constant 0 : index
    %c0_12 = arith.constant 0 : index
    %20 = vector.load %arg5[%c0_11, %c0_12] : memref<128x32xf32, #tpu.memory_space<vmem>>, vector<8x32xf32>
    tpu.vector_store %arg5[%c0_11, %c0_12], %16 {strides = array<i32>} : memref<128x32xf32, #tpu.memory_space<vmem>>, vector<8x32xf32>,
    %21 = vector.extract_strided_slice %2 {offsets = [8, 0], sizes = [8, 32], strides = [1, 1]} : vector<128x32xf32> to vector<8x32xf32>
    %cst_13 = arith.constant 0.949999988 : f32
    %22 = vector.broadcast %cst_13 : f32 to vector<8x32xf32>
    %23 = arith.mulf %22, %19 : vector<8x32xf32>
    %cst_14 = arith.constant 8.000000e-01 : f32
    %24 = vector.broadcast %cst_14 : f32 to vector<8x32xf32>
    %25 = arith.mulf %24, %10 : vector<8x32xf32>
    %26 = arith.addf %25, %21 : vector<8x32xf32>
    %27 = arith.addf %23, %26 : vector<8x32xf32>
    %cst_15 = arith.constant 5.000000e-01 : f32
    %28 = vector.broadcast %cst_15 : f32 to vector<8x32xf32>
    %29 = arith.cmpf ogt, %27, %28 : vector<8x32xf32>
    %cst_16 = arith.constant 1.000000e+00 : f32
    %cst_17 = arith.constant 0.000000e+00 : f32
    %30 = vector.broadcast %cst_16 : f32 to vector<8x32xf32>
    %31 = vector.broadcast %cst_17 : f32 to vector<8x32xf32>
    %32 = arith.select %29, %30, %31 : vector<8x32xi1>, vector<8x32xf32>
    %cst_18 = arith.constant 1.000000e+00 : f32
    %33 = vector.broadcast %cst_18 : f32 to vector<8x32xf32>
    %34 = arith.subf %33, %32 : vector<8x32xf32>
    %35 = arith.mulf %27, %34 : vector<8x32xf32>
    %c8 = arith.constant 8 : index
    %c0_19 = arith.constant 0 : index
    %36 = vector.load %arg5[%c8, %c0_19] : memref<128x32xf32, #tpu.memory_space<vmem>>, vector<8x32xf32>
    tpu.vector_store %arg5[%c8, %c0_19], %32 {strides = array<i32>} : memref<128x32xf32, #tpu.memory_space<vmem>>, vector<8x32xf32>,
    %37 = vector.extract_strided_slice %2 {offsets = [16, 0], sizes = [8, 32], strides = [1, 1]} : vector<128x32xf32> to vector<8x32xf32>
    %cst_20 = arith.constant 0.949999988 : f32
    %38 = vector.broadcast %cst_20 : f32 to vector<8x32xf32>
    %39 = arith.mulf %38, %35 : vector<8x32xf32>
    %cst_21 = arith.constant 8.000000e-01 : f32
    %40 = vector.broadcast %cst_21 : f32 to vector<8x32xf32>
    %41 = arith.mulf %40, %26 : vector<8x32xf32>
    %42 = arith.addf %41, %37 : vector<8x32xf32>
    %43 = arith.addf %39, %42 : vector<8x32xf32>
    %cst_22 = arith.constant 5.000000e-01 : f32
    %44 = vector.broadcast %cst_22 : f32 to vector<8x32xf32>
    %45 = arith.cmpf ogt, %43, %44 : vector<8x32xf32>
    %cst_23 = arith.constant 1.000000e+00 : f32
    %cst_24 = arith.constant 0.000000e+00 : f32
    %46 = vector.broadcast %cst_23 : f32 to vector<8x32xf32>
    %47 = vector.broadcast %cst_24 : f32 to vector<8x32xf32>
    %48 = arith.select %45, %46, %47 : vector<8x32xi1>, vector<8x32xf32>
    %cst_25 = arith.constant 1.000000e+00 : f32
    %49 = vector.broadcast %cst_25 : f32 to vector<8x32xf32>
    %50 = arith.subf %49, %48 : vector<8x32xf32>
    %51 = arith.mulf %43, %50 : vector<8x32xf32>
    %c16 = arith.constant 16 : index
    %c0_26 = arith.constant 0 : index
    %52 = vector.load %arg5[%c16, %c0_26] : memref<128x32xf32, #tpu.memory_space<vmem>>, vector<8x32xf32>
    tpu.vector_store %arg5[%c16, %c0_26], %48 {strides = array<i32>} : memref<128x32xf32, #tpu.memory_space<vmem>>, vector<8x32xf32>,
    %53 = vector.extract_strided_slice %2 {offsets = [24, 0], sizes = [8, 32], strides = [1, 1]} : vector<128x32xf32> to vector<8x32xf32>
    %cst_27 = arith.constant 0.949999988 : f32
    %54 = vector.broadcast %cst_27 : f32 to vector<8x32xf32>
    %55 = arith.mulf %54, %51 : vector<8x32xf32>
    %cst_28 = arith.constant 8.000000e-01 : f32
    %56 = vector.broadcast %cst_28 : f32 to vector<8x32xf32>
    %57 = arith.mulf %56, %42 : vector<8x32xf32>
    %58 = arith.addf %57, %53 : vector<8x32xf32>
    %59 = arith.addf %55, %58 : vector<8x32xf32>
    %cst_29 = arith.constant 5.000000e-01 : f32
    %60 = vector.broadcast %cst_29 : f32 to vector<8x32xf32>
    %61 = arith.cmpf ogt, %59, %60 : vector<8x32xf32>
    %cst_30 = arith.constant 1.000000e+00 : f32
    %cst_31 = arith.constant 0.000000e+00 : f32
    %62 = vector.broadcast %cst_30 : f32 to vector<8x32xf32>
    %63 = vector.broadcast %cst_31 : f32 to vector<8x32xf32>
    %64 = arith.select %61, %62, %63 : vector<8x32xi1>, vector<8x32xf32>
    %cst_32 = arith.constant 1.000000e+00 : f32
    %65 = vector.broadcast %cst_32 : f32 to vector<8x32xf32>
    %66 = arith.subf %65, %64 : vector<8x32xf32>
    %67 = arith.mulf %59, %66 : vector<8x32xf32>
    %c24 = arith.constant 24 : index
    %c0_33 = arith.constant 0 : index
    %68 = vector.load %arg5[%c24, %c0_33] : memref<128x32xf32, #tpu.memory_space<vmem>>, vector<8x32xf32>
    tpu.vector_store %arg5[%c24, %c0_33], %64 {strides = array<i32>} : memref<128x32xf32, #tpu.memory_space<vmem>>, vector<8x32xf32>,
    %69 = vector.extract_strided_slice %2 {offsets = [32, 0], sizes = [8, 32], strides = [1, 1]} : vector<128x32xf32> to vector<8x32xf32>
    %cst_34 = arith.constant 0.949999988 : f32
    %70 = vector.broadcast %cst_34 : f32 to vector<8x32xf32>
    %71 = arith.mulf %70, %67 : vector<8x32xf32>
    %cst_35 = arith.constant 8.000000e-01 : f32
    %72 = vector.broadcast %cst_35 : f32 to vector<8x32xf32>
    %73 = arith.mulf %72, %58 : vector<8x32xf32>
    %74 = arith.addf %73, %69 : vector<8x32xf32>
    %75 = arith.addf %71, %74 : vector<8x32xf32>
    %cst_36 = arith.constant 5.000000e-01 : f32
    %76 = vector.broadcast %cst_36 : f32 to vector<8x32xf32>
    %77 = arith.cmpf ogt, %75, %76 : vector<8x32xf32>
    %cst_37 = arith.constant 1.000000e+00 : f32
    %cst_38 = arith.constant 0.000000e+00 : f32
    %78 = vector.broadcast %cst_37 : f32 to vector<8x32xf32>
    %79 = vector.broadcast %cst_38 : f32 to vector<8x32xf32>
    %80 = arith.select %77, %78, %79 : vector<8x32xi1>, vector<8x32xf32>
    %cst_39 = arith.constant 1.000000e+00 : f32
    %81 = vector.broadcast %cst_39 : f32 to vector<8x32xf32>
    %82 = arith.subf %81, %80 : vector<8x32xf32>
    %83 = arith.mulf %75, %82 : vector<8x32xf32>
    %c32 = arith.constant 32 : index
    %c0_40 = arith.constant 0 : index
    %84 = vector.load %arg5[%c32, %c0_40] : memref<128x32xf32, #tpu.memory_space<vmem>>, vector<8x32xf32>
    tpu.vector_store %arg5[%c32, %c0_40], %80 {strides = array<i32>} : memref<128x32xf32, #tpu.memory_space<vmem>>, vector<8x32xf32>,
    %85 = vector.extract_strided_slice %2 {offsets = [40, 0], sizes = [8, 32], strides = [1, 1]} : vector<128x32xf32> to vector<8x32xf32>
    %cst_41 = arith.constant 0.949999988 : f32
    %86 = vector.broadcast %cst_41 : f32 to vector<8x32xf32>
    %87 = arith.mulf %86, %83 : vector<8x32xf32>
    %cst_42 = arith.constant 8.000000e-01 : f32
    %88 = vector.broadcast %cst_42 : f32 to vector<8x32xf32>
    %89 = arith.mulf %88, %74 : vector<8x32xf32>
    %90 = arith.addf %89, %85 : vector<8x32xf32>
    %91 = arith.addf %87, %90 : vector<8x32xf32>
    %cst_43 = arith.constant 5.000000e-01 : f32
    %92 = vector.broadcast %cst_43 : f32 to vector<8x32xf32>
    %93 = arith.cmpf ogt, %91, %92 : vector<8x32xf32>
    %cst_44 = arith.constant 1.000000e+00 : f32
    %cst_45 = arith.constant 0.000000e+00 : f32
    %94 = vector.broadcast %cst_44 : f32 to vector<8x32xf32>
    %95 = vector.broadcast %cst_45 : f32 to vector<8x32xf32>
    %96 = arith.select %93, %94, %95 : vector<8x32xi1>, vector<8x32xf32>
    %cst_46 = arith.constant 1.000000e+00 : f32
    %97 = vector.broadcast %cst_46 : f32 to vector<8x32xf32>
    %98 = arith.subf %97, %96 : vector<8x32xf32>
    %99 = arith.mulf %91, %98 : vector<8x32xf32>
    %c40 = arith.constant 40 : index
    %c0_47 = arith.constant 0 : index
    %100 = vector.load %arg5[%c40, %c0_47] : memref<128x32xf32, #tpu.memory_space<vmem>>, vector<8x32xf32>
    tpu.vector_store %arg5[%c40, %c0_47], %96 {strides = array<i32>} : memref<128x32xf32, #tpu.memory_space<vmem>>, vector<8x32xf32>,
    %101 = vector.extract_strided_slice %2 {offsets = [48, 0], sizes = [8, 32], strides = [1, 1]} : vector<128x32xf32> to vector<8x32xf32>
    %cst_48 = arith.constant 0.949999988 : f32
    %102 = vector.broadcast %cst_48 : f32 to vector<8x32xf32>
    %103 = arith.mulf %102, %99 : vector<8x32xf32>
    %cst_49 = arith.constant 8.000000e-01 : f32
    %104 = vector.broadcast %cst_49 : f32 to vector<8x32xf32>
    %105 = arith.mulf %104, %90 : vector<8x32xf32>
    %106 = arith.addf %105, %101 : vector<8x32xf32>
    %107 = arith.addf %103, %106 : vector<8x32xf32>
    %cst_50 = arith.constant 5.000000e-01 : f32
    %108 = vector.broadcast %cst_50 : f32 to vector<8x32xf32>
    %109 = arith.cmpf ogt, %107, %108 : vector<8x32xf32>
    %cst_51 = arith.constant 1.000000e+00 : f32
    %cst_52 = arith.constant 0.000000e+00 : f32
    %110 = vector.broadcast %cst_51 : f32 to vector<8x32xf32>
    %111 = vector.broadcast %cst_52 : f32 to vector<8x32xf32>
    %112 = arith.select %109, %110, %111 : vector<8x32xi1>, vector<8x32xf32>
    %cst_53 = arith.constant 1.000000e+00 : f32
    %113 = vector.broadcast %cst_53 : f32 to vector<8x32xf32>
    %114 = arith.subf %113, %112 : vector<8x32xf32>
    %115 = arith.mulf %107, %114 : vector<8x32xf32>
    %c48 = arith.constant 48 : index
    %c0_54 = arith.constant 0 : index
    %116 = vector.load %arg5[%c48, %c0_54] : memref<128x32xf32, #tpu.memory_space<vmem>>, vector<8x32xf32>
    tpu.vector_store %arg5[%c48, %c0_54], %112 {strides = array<i32>} : memref<128x32xf32, #tpu.memory_space<vmem>>, vector<8x32xf32>,
    %117 = vector.extract_strided_slice %2 {offsets = [56, 0], sizes = [8, 32], strides = [1, 1]} : vector<128x32xf32> to vector<8x32xf32>
    %cst_55 = arith.constant 0.949999988 : f32
    %118 = vector.broadcast %cst_55 : f32 to vector<8x32xf32>
    %119 = arith.mulf %118, %115 : vector<8x32xf32>
    %cst_56 = arith.constant 8.000000e-01 : f32
    %120 = vector.broadcast %cst_56 : f32 to vector<8x32xf32>
    %121 = arith.mulf %120, %106 : vector<8x32xf32>
    %122 = arith.addf %121, %117 : vector<8x32xf32>
    %123 = arith.addf %119, %122 : vector<8x32xf32>
    %cst_57 = arith.constant 5.000000e-01 : f32
    %124 = vector.broadcast %cst_57 : f32 to vector<8x32xf32>
    %125 = arith.cmpf ogt, %123, %124 : vector<8x32xf32>
    %cst_58 = arith.constant 1.000000e+00 : f32
    %cst_59 = arith.constant 0.000000e+00 : f32
    %126 = vector.broadcast %cst_58 : f32 to vector<8x32xf32>
    %127 = vector.broadcast %cst_59 : f32 to vector<8x32xf32>
    %128 = arith.select %125, %126, %127 : vector<8x32xi1>, vector<8x32xf32>
    %cst_60 = arith.constant 1.000000e+00 : f32
    %129 = vector.broadcast %cst_60 : f32 to vector<8x32xf32>
    %130 = arith.subf %129, %128 : vector<8x32xf32>
    %131 = arith.mulf %123, %130 : vector<8x32xf32>
    %c56 = arith.constant 56 : index
    %c0_61 = arith.constant 0 : index
    %132 = vector.load %arg5[%c56, %c0_61] : memref<128x32xf32, #tpu.memory_space<vmem>>, vector<8x32xf32>
    tpu.vector_store %arg5[%c56, %c0_61], %128 {strides = array<i32>} : memref<128x32xf32, #tpu.memory_space<vmem>>, vector<8x32xf32>,
    %133 = vector.extract_strided_slice %2 {offsets = [64, 0], sizes = [8, 32], strides = [1, 1]} : vector<128x32xf32> to vector<8x32xf32>
    %cst_62 = arith.constant 0.949999988 : f32
    %134 = vector.broadcast %cst_62 : f32 to vector<8x32xf32>
    %135 = arith.mulf %134, %131 : vector<8x32xf32>
    %cst_63 = arith.constant 8.000000e-01 : f32
    %136 = vector.broadcast %cst_63 : f32 to vector<8x32xf32>
    %137 = arith.mulf %136, %122 : vector<8x32xf32>
    %138 = arith.addf %137, %133 : vector<8x32xf32>
    %139 = arith.addf %135, %138 : vector<8x32xf32>
    %cst_64 = arith.constant 5.000000e-01 : f32
    %140 = vector.broadcast %cst_64 : f32 to vector<8x32xf32>
    %141 = arith.cmpf ogt, %139, %140 : vector<8x32xf32>
    %cst_65 = arith.constant 1.000000e+00 : f32
    %cst_66 = arith.constant 0.000000e+00 : f32
    %142 = vector.broadcast %cst_65 : f32 to vector<8x32xf32>
    %143 = vector.broadcast %cst_66 : f32 to vector<8x32xf32>
    %144 = arith.select %141, %142, %143 : vector<8x32xi1>, vector<8x32xf32>
    %cst_67 = arith.constant 1.000000e+00 : f32
    %145 = vector.broadcast %cst_67 : f32 to vector<8x32xf32>
    %146 = arith.subf %145, %144 : vector<8x32xf32>
    %147 = arith.mulf %139, %146 : vector<8x32xf32>
    %c64 = arith.constant 64 : index
    %c0_68 = arith.constant 0 : index
    %148 = vector.load %arg5[%c64, %c0_68] : memref<128x32xf32, #tpu.memory_space<vmem>>, vector<8x32xf32>
    tpu.vector_store %arg5[%c64, %c0_68], %144 {strides = array<i32>} : memref<128x32xf32, #tpu.memory_space<vmem>>, vector<8x32xf32>,
    %149 = vector.extract_strided_slice %2 {offsets = [72, 0], sizes = [8, 32], strides = [1, 1]} : vector<128x32xf32> to vector<8x32xf32>
    %cst_69 = arith.constant 0.949999988 : f32
    %150 = vector.broadcast %cst_69 : f32 to vector<8x32xf32>
    %151 = arith.mulf %150, %147 : vector<8x32xf32>
    %cst_70 = arith.constant 8.000000e-01 : f32
    %152 = vector.broadcast %cst_70 : f32 to vector<8x32xf32>
    %153 = arith.mulf %152, %138 : vector<8x32xf32>
    %154 = arith.addf %153, %149 : vector<8x32xf32>
    %155 = arith.addf %151, %154 : vector<8x32xf32>
    %cst_71 = arith.constant 5.000000e-01 : f32
    %156 = vector.broadcast %cst_71 : f32 to vector<8x32xf32>
    %157 = arith.cmpf ogt, %155, %156 : vector<8x32xf32>
    %cst_72 = arith.constant 1.000000e+00 : f32
    %cst_73 = arith.constant 0.000000e+00 : f32
    %158 = vector.broadcast %cst_72 : f32 to vector<8x32xf32>
    %159 = vector.broadcast %cst_73 : f32 to vector<8x32xf32>
    %160 = arith.select %157, %158, %159 : vector<8x32xi1>, vector<8x32xf32>
    %cst_74 = arith.constant 1.000000e+00 : f32
    %161 = vector.broadcast %cst_74 : f32 to vector<8x32xf32>
    %162 = arith.subf %161, %160 : vector<8x32xf32>
    %163 = arith.mulf %155, %162 : vector<8x32xf32>
    %c72 = arith.constant 72 : index
    %c0_75 = arith.constant 0 : index
    %164 = vector.load %arg5[%c72, %c0_75] : memref<128x32xf32, #tpu.memory_space<vmem>>, vector<8x32xf32>
    tpu.vector_store %arg5[%c72, %c0_75], %160 {strides = array<i32>} : memref<128x32xf32, #tpu.memory_space<vmem>>, vector<8x32xf32>,
    %165 = vector.extract_strided_slice %2 {offsets = [80, 0], sizes = [8, 32], strides = [1, 1]} : vector<128x32xf32> to vector<8x32xf32>
    %cst_76 = arith.constant 0.949999988 : f32
    %166 = vector.broadcast %cst_76 : f32 to vector<8x32xf32>
    %167 = arith.mulf %166, %163 : vector<8x32xf32>
    %cst_77 = arith.constant 8.000000e-01 : f32
    %168 = vector.broadcast %cst_77 : f32 to vector<8x32xf32>
    %169 = arith.mulf %168, %154 : vector<8x32xf32>
    %170 = arith.addf %169, %165 : vector<8x32xf32>
    %171 = arith.addf %167, %170 : vector<8x32xf32>
    %cst_78 = arith.constant 5.000000e-01 : f32
    %172 = vector.broadcast %cst_78 : f32 to vector<8x32xf32>
    %173 = arith.cmpf ogt, %171, %172 : vector<8x32xf32>
    %cst_79 = arith.constant 1.000000e+00 : f32
    %cst_80 = arith.constant 0.000000e+00 : f32
    %174 = vector.broadcast %cst_79 : f32 to vector<8x32xf32>
    %175 = vector.broadcast %cst_80 : f32 to vector<8x32xf32>
    %176 = arith.select %173, %174, %175 : vector<8x32xi1>, vector<8x32xf32>
    %cst_81 = arith.constant 1.000000e+00 : f32
    %177 = vector.broadcast %cst_81 : f32 to vector<8x32xf32>
    %178 = arith.subf %177, %176 : vector<8x32xf32>
    %179 = arith.mulf %171, %178 : vector<8x32xf32>
    %c80 = arith.constant 80 : index
    %c0_82 = arith.constant 0 : index
    %180 = vector.load %arg5[%c80, %c0_82] : memref<128x32xf32, #tpu.memory_space<vmem>>, vector<8x32xf32>
    tpu.vector_store %arg5[%c80, %c0_82], %176 {strides = array<i32>} : memref<128x32xf32, #tpu.memory_space<vmem>>, vector<8x32xf32>,
    %181 = vector.extract_strided_slice %2 {offsets = [88, 0], sizes = [8, 32], strides = [1, 1]} : vector<128x32xf32> to vector<8x32xf32>
    %cst_83 = arith.constant 0.949999988 : f32
    %182 = vector.broadcast %cst_83 : f32 to vector<8x32xf32>
    %183 = arith.mulf %182, %179 : vector<8x32xf32>
    %cst_84 = arith.constant 8.000000e-01 : f32
    %184 = vector.broadcast %cst_84 : f32 to vector<8x32xf32>
    %185 = arith.mulf %184, %170 : vector<8x32xf32>
    %186 = arith.addf %185, %181 : vector<8x32xf32>
    %187 = arith.addf %183, %186 : vector<8x32xf32>
    %cst_85 = arith.constant 5.000000e-01 : f32
    %188 = vector.broadcast %cst_85 : f32 to vector<8x32xf32>
    %189 = arith.cmpf ogt, %187, %188 : vector<8x32xf32>
    %cst_86 = arith.constant 1.000000e+00 : f32
    %cst_87 = arith.constant 0.000000e+00 : f32
    %190 = vector.broadcast %cst_86 : f32 to vector<8x32xf32>
    %191 = vector.broadcast %cst_87 : f32 to vector<8x32xf32>
    %192 = arith.select %189, %190, %191 : vector<8x32xi1>, vector<8x32xf32>
    %cst_88 = arith.constant 1.000000e+00 : f32
    %193 = vector.broadcast %cst_88 : f32 to vector<8x32xf32>
    %194 = arith.subf %193, %192 : vector<8x32xf32>
    %195 = arith.mulf %187, %194 : vector<8x32xf32>
    %c88 = arith.constant 88 : index
    %c0_89 = arith.constant 0 : index
    %196 = vector.load %arg5[%c88, %c0_89] : memref<128x32xf32, #tpu.memory_space<vmem>>, vector<8x32xf32>
    tpu.vector_store %arg5[%c88, %c0_89], %192 {strides = array<i32>} : memref<128x32xf32, #tpu.memory_space<vmem>>, vector<8x32xf32>,
    %197 = vector.extract_strided_slice %2 {offsets = [96, 0], sizes = [8, 32], strides = [1, 1]} : vector<128x32xf32> to vector<8x32xf32>
    %cst_90 = arith.constant 0.949999988 : f32
    %198 = vector.broadcast %cst_90 : f32 to vector<8x32xf32>
    %199 = arith.mulf %198, %195 : vector<8x32xf32>
    %cst_91 = arith.constant 8.000000e-01 : f32
    %200 = vector.broadcast %cst_91 : f32 to vector<8x32xf32>
    %201 = arith.mulf %200, %186 : vector<8x32xf32>
    %202 = arith.addf %201, %197 : vector<8x32xf32>
    %203 = arith.addf %199, %202 : vector<8x32xf32>
    %cst_92 = arith.constant 5.000000e-01 : f32
    %204 = vector.broadcast %cst_92 : f32 to vector<8x32xf32>
    %205 = arith.cmpf ogt, %203, %204 : vector<8x32xf32>
    %cst_93 = arith.constant 1.000000e+00 : f32
    %cst_94 = arith.constant 0.000000e+00 : f32
    %206 = vector.broadcast %cst_93 : f32 to vector<8x32xf32>
    %207 = vector.broadcast %cst_94 : f32 to vector<8x32xf32>
    %208 = arith.select %205, %206, %207 : vector<8x32xi1>, vector<8x32xf32>
    %cst_95 = arith.constant 1.000000e+00 : f32
    %209 = vector.broadcast %cst_95 : f32 to vector<8x32xf32>
    %210 = arith.subf %209, %208 : vector<8x32xf32>
    %211 = arith.mulf %203, %210 : vector<8x32xf32>
    %c96 = arith.constant 96 : index
    %c0_96 = arith.constant 0 : index
    %212 = vector.load %arg5[%c96, %c0_96] : memref<128x32xf32, #tpu.memory_space<vmem>>, vector<8x32xf32>
    tpu.vector_store %arg5[%c96, %c0_96], %208 {strides = array<i32>} : memref<128x32xf32, #tpu.memory_space<vmem>>, vector<8x32xf32>,
    %213 = vector.extract_strided_slice %2 {offsets = [104, 0], sizes = [8, 32], strides = [1, 1]} : vector<128x32xf32> to vector<8x32xf32>
    %cst_97 = arith.constant 0.949999988 : f32
    %214 = vector.broadcast %cst_97 : f32 to vector<8x32xf32>
    %215 = arith.mulf %214, %211 : vector<8x32xf32>
    %cst_98 = arith.constant 8.000000e-01 : f32
    %216 = vector.broadcast %cst_98 : f32 to vector<8x32xf32>
    %217 = arith.mulf %216, %202 : vector<8x32xf32>
    %218 = arith.addf %217, %213 : vector<8x32xf32>
    %219 = arith.addf %215, %218 : vector<8x32xf32>
    %cst_99 = arith.constant 5.000000e-01 : f32
    %220 = vector.broadcast %cst_99 : f32 to vector<8x32xf32>
    %221 = arith.cmpf ogt, %219, %220 : vector<8x32xf32>
    %cst_100 = arith.constant 1.000000e+00 : f32
    %cst_101 = arith.constant 0.000000e+00 : f32
    %222 = vector.broadcast %cst_100 : f32 to vector<8x32xf32>
    %223 = vector.broadcast %cst_101 : f32 to vector<8x32xf32>
    %224 = arith.select %221, %222, %223 : vector<8x32xi1>, vector<8x32xf32>
    %cst_102 = arith.constant 1.000000e+00 : f32
    %225 = vector.broadcast %cst_102 : f32 to vector<8x32xf32>
    %226 = arith.subf %225, %224 : vector<8x32xf32>
    %227 = arith.mulf %219, %226 : vector<8x32xf32>
    %c104 = arith.constant 104 : index
    %c0_103 = arith.constant 0 : index
    %228 = vector.load %arg5[%c104, %c0_103] : memref<128x32xf32, #tpu.memory_space<vmem>>, vector<8x32xf32>
    tpu.vector_store %arg5[%c104, %c0_103], %224 {strides = array<i32>} : memref<128x32xf32, #tpu.memory_space<vmem>>, vector<8x32xf32>,
    %229 = vector.extract_strided_slice %2 {offsets = [112, 0], sizes = [8, 32], strides = [1, 1]} : vector<128x32xf32> to vector<8x32xf32>
    %cst_104 = arith.constant 0.949999988 : f32
    %230 = vector.broadcast %cst_104 : f32 to vector<8x32xf32>
    %231 = arith.mulf %230, %227 : vector<8x32xf32>
    %cst_105 = arith.constant 8.000000e-01 : f32
    %232 = vector.broadcast %cst_105 : f32 to vector<8x32xf32>
    %233 = arith.mulf %232, %218 : vector<8x32xf32>
    %234 = arith.addf %233, %229 : vector<8x32xf32>
    %235 = arith.addf %231, %234 : vector<8x32xf32>
    %cst_106 = arith.constant 5.000000e-01 : f32
    %236 = vector.broadcast %cst_106 : f32 to vector<8x32xf32>
    %237 = arith.cmpf ogt, %235, %236 : vector<8x32xf32>
    %cst_107 = arith.constant 1.000000e+00 : f32
    %cst_108 = arith.constant 0.000000e+00 : f32
    %238 = vector.broadcast %cst_107 : f32 to vector<8x32xf32>
    %239 = vector.broadcast %cst_108 : f32 to vector<8x32xf32>
    %240 = arith.select %237, %238, %239 : vector<8x32xi1>, vector<8x32xf32>
    %cst_109 = arith.constant 1.000000e+00 : f32
    %241 = vector.broadcast %cst_109 : f32 to vector<8x32xf32>
    %242 = arith.subf %241, %240 : vector<8x32xf32>
    %243 = arith.mulf %235, %242 : vector<8x32xf32>
    %c112 = arith.constant 112 : index
    %c0_110 = arith.constant 0 : index
    %244 = vector.load %arg5[%c112, %c0_110] : memref<128x32xf32, #tpu.memory_space<vmem>>, vector<8x32xf32>
    tpu.vector_store %arg5[%c112, %c0_110], %240 {strides = array<i32>} : memref<128x32xf32, #tpu.memory_space<vmem>>, vector<8x32xf32>,
    %245 = vector.extract_strided_slice %2 {offsets = [120, 0], sizes = [8, 32], strides = [1, 1]} : vector<128x32xf32> to vector<8x32xf32>
    %cst_111 = arith.constant 0.949999988 : f32
    %246 = vector.broadcast %cst_111 : f32 to vector<8x32xf32>
    %247 = arith.mulf %246, %243 : vector<8x32xf32>
    %cst_112 = arith.constant 8.000000e-01 : f32
    %248 = vector.broadcast %cst_112 : f32 to vector<8x32xf32>
    %249 = arith.mulf %248, %234 : vector<8x32xf32>
    %250 = arith.addf %249, %245 : vector<8x32xf32>
    %251 = arith.addf %247, %250 : vector<8x32xf32>
    %cst_113 = arith.constant 5.000000e-01 : f32
    %252 = vector.broadcast %cst_113 : f32 to vector<8x32xf32>
    %253 = arith.cmpf ogt, %251, %252 : vector<8x32xf32>
    %cst_114 = arith.constant 1.000000e+00 : f32
    %cst_115 = arith.constant 0.000000e+00 : f32
    %254 = vector.broadcast %cst_114 : f32 to vector<8x32xf32>
    %255 = vector.broadcast %cst_115 : f32 to vector<8x32xf32>
    %256 = arith.select %253, %254, %255 : vector<8x32xi1>, vector<8x32xf32>
    %c120 = arith.constant 120 : index
    %c0_116 = arith.constant 0 : index
    %257 = vector.load %arg5[%c120, %c0_116] : memref<128x32xf32, #tpu.memory_space<vmem>>, vector<8x32xf32>
    tpu.vector_store %arg5[%c120, %c0_116], %256 {strides = array<i32>} : memref<128x32xf32, #tpu.memory_space<vmem>>, vector<8x32xf32>,
    %c0_117 = arith.constant 0 : index
    %c0_118 = arith.constant 0 : index
    %258 = vector.load %arg5[%c0_117, %c0_118] : memref<128x32xf32, #tpu.memory_space<vmem>>, vector<128x32xf32>
    %259 = arith.truncf %258 : vector<128x32xf32> to vector<128x32xbf16>
    %c0_119 = arith.constant 0 : index
    %c0_120 = arith.constant 0 : index
    %260 = vector.load %arg2[%c0_119, %c0_120] : memref<32x32xbf16, #tpu.memory_space<vmem>>, vector<32x32xbf16>
    %cst_121 = arith.constant dense<0.000000e+00> : vector<128x32xf32>
    %261 = tpu.matmul %259, %260, %cst_121 {dimension_numbers = #tpu.dot_dimension_numbers<[1], [0], [0], [1], [0, 0, 1, 1], [], []>} : vector<128x32xbf16>, vector<32x32xbf16>, vector<128x32xf32> -> vector<128x32xf32>
    %cst_122 = arith.constant 0.000000e+00 : f32
    %262 = vector.broadcast %cst_122 : f32 to vector<8x32xf32>
    %cst_123 = arith.constant 0.000000e+00 : f32
    %263 = vector.broadcast %cst_123 : f32 to vector<8x32xf32>
    %264 = vector.extract_strided_slice %261 {offsets = [0, 0], sizes = [8, 32], strides = [1, 1]} : vector<128x32xf32> to vector<8x32xf32>
    %cst_124 = arith.constant 0.949999988 : f32
    %265 = vector.broadcast %cst_124 : f32 to vector<8x32xf32>
    %266 = arith.mulf %265, %262 : vector<8x32xf32>
    %cst_125 = arith.constant 8.000000e-01 : f32
    %267 = vector.broadcast %cst_125 : f32 to vector<8x32xf32>
    %268 = arith.mulf %267, %263 : vector<8x32xf32>
    %269 = arith.addf %268, %264 : vector<8x32xf32>
    %270 = arith.addf %266, %269 : vector<8x32xf32>
    %cst_126 = arith.constant 5.000000e-01 : f32
    %271 = vector.broadcast %cst_126 : f32 to vector<8x32xf32>
    %272 = arith.cmpf ogt, %270, %271 : vector<8x32xf32>
    %cst_127 = arith.constant 1.000000e+00 : f32
    %cst_128 = arith.constant 0.000000e+00 : f32
    %273 = vector.broadcast %cst_127 : f32 to vector<8x32xf32>
    %274 = vector.broadcast %cst_128 : f32 to vector<8x32xf32>
    %275 = arith.select %272, %273, %274 : vector<8x32xi1>, vector<8x32xf32>
    %cst_129 = arith.constant 1.000000e+00 : f32
    %276 = vector.broadcast %cst_129 : f32 to vector<8x32xf32>
    %277 = arith.subf %276, %275 : vector<8x32xf32>
    %278 = arith.mulf %270, %277 : vector<8x32xf32>
    %c0_130 = arith.constant 0 : index
    %c0_131 = arith.constant 0 : index
    %279 = vector.load %arg6[%c0_130, %c0_131] : memref<128x32xf32, #tpu.memory_space<vmem>>, vector<8x32xf32>
    tpu.vector_store %arg6[%c0_130, %c0_131], %275 {strides = array<i32>} : memref<128x32xf32, #tpu.memory_space<vmem>>, vector<8x32xf32>,
    %280 = vector.extract_strided_slice %261 {offsets = [8, 0], sizes = [8, 32], strides = [1, 1]} : vector<128x32xf32> to vector<8x32xf32>
    %cst_132 = arith.constant 0.949999988 : f32
    %281 = vector.broadcast %cst_132 : f32 to vector<8x32xf32>
    %282 = arith.mulf %281, %278 : vector<8x32xf32>
    %cst_133 = arith.constant 8.000000e-01 : f32
    %283 = vector.broadcast %cst_133 : f32 to vector<8x32xf32>
    %284 = arith.mulf %283, %269 : vector<8x32xf32>
    %285 = arith.addf %284, %280 : vector<8x32xf32>
    %286 = arith.addf %282, %285 : vector<8x32xf32>
    %cst_134 = arith.constant 5.000000e-01 : f32
    %287 = vector.broadcast %cst_134 : f32 to vector<8x32xf32>
    %288 = arith.cmpf ogt, %286, %287 : vector<8x32xf32>
    %cst_135 = arith.constant 1.000000e+00 : f32
    %cst_136 = arith.constant 0.000000e+00 : f32
    %289 = vector.broadcast %cst_135 : f32 to vector<8x32xf32>
    %290 = vector.broadcast %cst_136 : f32 to vector<8x32xf32>
    %291 = arith.select %288, %289, %290 : vector<8x32xi1>, vector<8x32xf32>
    %cst_137 = arith.constant 1.000000e+00 : f32
    %292 = vector.broadcast %cst_137 : f32 to vector<8x32xf32>
    %293 = arith.subf %292, %291 : vector<8x32xf32>
    %294 = arith.mulf %286, %293 : vector<8x32xf32>
    %c8_138 = arith.constant 8 : index
    %c0_139 = arith.constant 0 : index
    %295 = vector.load %arg6[%c8_138, %c0_139] : memref<128x32xf32, #tpu.memory_space<vmem>>, vector<8x32xf32>
    tpu.vector_store %arg6[%c8_138, %c0_139], %291 {strides = array<i32>} : memref<128x32xf32, #tpu.memory_space<vmem>>, vector<8x32xf32>,
    %296 = vector.extract_strided_slice %261 {offsets = [16, 0], sizes = [8, 32], strides = [1, 1]} : vector<128x32xf32> to vector<8x32xf32>
    %cst_140 = arith.constant 0.949999988 : f32
    %297 = vector.broadcast %cst_140 : f32 to vector<8x32xf32>
    %298 = arith.mulf %297, %294 : vector<8x32xf32>
    %cst_141 = arith.constant 8.000000e-01 : f32
    %299 = vector.broadcast %cst_141 : f32 to vector<8x32xf32>
    %300 = arith.mulf %299, %285 : vector<8x32xf32>
    %301 = arith.addf %300, %296 : vector<8x32xf32>
    %302 = arith.addf %298, %301 : vector<8x32xf32>
    %cst_142 = arith.constant 5.000000e-01 : f32
    %303 = vector.broadcast %cst_142 : f32 to vector<8x32xf32>
    %304 = arith.cmpf ogt, %302, %303 : vector<8x32xf32>
    %cst_143 = arith.constant 1.000000e+00 : f32
    %cst_144 = arith.constant 0.000000e+00 : f32
    %305 = vector.broadcast %cst_143 : f32 to vector<8x32xf32>
    %306 = vector.broadcast %cst_144 : f32 to vector<8x32xf32>
    %307 = arith.select %304, %305, %306 : vector<8x32xi1>, vector<8x32xf32>
    %cst_145 = arith.constant 1.000000e+00 : f32
    %308 = vector.broadcast %cst_145 : f32 to vector<8x32xf32>
    %309 = arith.subf %308, %307 : vector<8x32xf32>
    %310 = arith.mulf %302, %309 : vector<8x32xf32>
    %c16_146 = arith.constant 16 : index
    %c0_147 = arith.constant 0 : index
    %311 = vector.load %arg6[%c16_146, %c0_147] : memref<128x32xf32, #tpu.memory_space<vmem>>, vector<8x32xf32>
    tpu.vector_store %arg6[%c16_146, %c0_147], %307 {strides = array<i32>} : memref<128x32xf32, #tpu.memory_space<vmem>>, vector<8x32xf32>,
    %312 = vector.extract_strided_slice %261 {offsets = [24, 0], sizes = [8, 32], strides = [1, 1]} : vector<128x32xf32> to vector<8x32xf32>
    %cst_148 = arith.constant 0.949999988 : f32
    %313 = vector.broadcast %cst_148 : f32 to vector<8x32xf32>
    %314 = arith.mulf %313, %310 : vector<8x32xf32>
    %cst_149 = arith.constant 8.000000e-01 : f32
    %315 = vector.broadcast %cst_149 : f32 to vector<8x32xf32>
    %316 = arith.mulf %315, %301 : vector<8x32xf32>
    %317 = arith.addf %316, %312 : vector<8x32xf32>
    %318 = arith.addf %314, %317 : vector<8x32xf32>
    %cst_150 = arith.constant 5.000000e-01 : f32
    %319 = vector.broadcast %cst_150 : f32 to vector<8x32xf32>
    %320 = arith.cmpf ogt, %318, %319 : vector<8x32xf32>
    %cst_151 = arith.constant 1.000000e+00 : f32
    %cst_152 = arith.constant 0.000000e+00 : f32
    %321 = vector.broadcast %cst_151 : f32 to vector<8x32xf32>
    %322 = vector.broadcast %cst_152 : f32 to vector<8x32xf32>
    %323 = arith.select %320, %321, %322 : vector<8x32xi1>, vector<8x32xf32>
    %cst_153 = arith.constant 1.000000e+00 : f32
    %324 = vector.broadcast %cst_153 : f32 to vector<8x32xf32>
    %325 = arith.subf %324, %323 : vector<8x32xf32>
    %326 = arith.mulf %318, %325 : vector<8x32xf32>
    %c24_154 = arith.constant 24 : index
    %c0_155 = arith.constant 0 : index
    %327 = vector.load %arg6[%c24_154, %c0_155] : memref<128x32xf32, #tpu.memory_space<vmem>>, vector<8x32xf32>
    tpu.vector_store %arg6[%c24_154, %c0_155], %323 {strides = array<i32>} : memref<128x32xf32, #tpu.memory_space<vmem>>, vector<8x32xf32>,
    %328 = vector.extract_strided_slice %261 {offsets = [32, 0], sizes = [8, 32], strides = [1, 1]} : vector<128x32xf32> to vector<8x32xf32>
    %cst_156 = arith.constant 0.949999988 : f32
    %329 = vector.broadcast %cst_156 : f32 to vector<8x32xf32>
    %330 = arith.mulf %329, %326 : vector<8x32xf32>
    %cst_157 = arith.constant 8.000000e-01 : f32
    %331 = vector.broadcast %cst_157 : f32 to vector<8x32xf32>
    %332 = arith.mulf %331, %317 : vector<8x32xf32>
    %333 = arith.addf %332, %328 : vector<8x32xf32>
    %334 = arith.addf %330, %333 : vector<8x32xf32>
    %cst_158 = arith.constant 5.000000e-01 : f32
    %335 = vector.broadcast %cst_158 : f32 to vector<8x32xf32>
    %336 = arith.cmpf ogt, %334, %335 : vector<8x32xf32>
    %cst_159 = arith.constant 1.000000e+00 : f32
    %cst_160 = arith.constant 0.000000e+00 : f32
    %337 = vector.broadcast %cst_159 : f32 to vector<8x32xf32>
    %338 = vector.broadcast %cst_160 : f32 to vector<8x32xf32>
    %339 = arith.select %336, %337, %338 : vector<8x32xi1>, vector<8x32xf32>
    %cst_161 = arith.constant 1.000000e+00 : f32
    %340 = vector.broadcast %cst_161 : f32 to vector<8x32xf32>
    %341 = arith.subf %340, %339 : vector<8x32xf32>
    %342 = arith.mulf %334, %341 : vector<8x32xf32>
    %c32_162 = arith.constant 32 : index
    %c0_163 = arith.constant 0 : index
    %343 = vector.load %arg6[%c32_162, %c0_163] : memref<128x32xf32, #tpu.memory_space<vmem>>, vector<8x32xf32>
    tpu.vector_store %arg6[%c32_162, %c0_163], %339 {strides = array<i32>} : memref<128x32xf32, #tpu.memory_space<vmem>>, vector<8x32xf32>,
    %344 = vector.extract_strided_slice %261 {offsets = [40, 0], sizes = [8, 32], strides = [1, 1]} : vector<128x32xf32> to vector<8x32xf32>
    %cst_164 = arith.constant 0.949999988 : f32
    %345 = vector.broadcast %cst_164 : f32 to vector<8x32xf32>
    %346 = arith.mulf %345, %342 : vector<8x32xf32>
    %cst_165 = arith.constant 8.000000e-01 : f32
    %347 = vector.broadcast %cst_165 : f32 to vector<8x32xf32>
    %348 = arith.mulf %347, %333 : vector<8x32xf32>
    %349 = arith.addf %348, %344 : vector<8x32xf32>
    %350 = arith.addf %346, %349 : vector<8x32xf32>
    %cst_166 = arith.constant 5.000000e-01 : f32
    %351 = vector.broadcast %cst_166 : f32 to vector<8x32xf32>
    %352 = arith.cmpf ogt, %350, %351 : vector<8x32xf32>
    %cst_167 = arith.constant 1.000000e+00 : f32
    %cst_168 = arith.constant 0.000000e+00 : f32
    %353 = vector.broadcast %cst_167 : f32 to vector<8x32xf32>
    %354 = vector.broadcast %cst_168 : f32 to vector<8x32xf32>
    %355 = arith.select %352, %353, %354 : vector<8x32xi1>, vector<8x32xf32>
    %cst_169 = arith.constant 1.000000e+00 : f32
    %356 = vector.broadcast %cst_169 : f32 to vector<8x32xf32>
    %357 = arith.subf %356, %355 : vector<8x32xf32>
    %358 = arith.mulf %350, %357 : vector<8x32xf32>
    %c40_170 = arith.constant 40 : index
    %c0_171 = arith.constant 0 : index
    %359 = vector.load %arg6[%c40_170, %c0_171] : memref<128x32xf32, #tpu.memory_space<vmem>>, vector<8x32xf32>
    tpu.vector_store %arg6[%c40_170, %c0_171], %355 {strides = array<i32>} : memref<128x32xf32, #tpu.memory_space<vmem>>, vector<8x32xf32>,
    %360 = vector.extract_strided_slice %261 {offsets = [48, 0], sizes = [8, 32], strides = [1, 1]} : vector<128x32xf32> to vector<8x32xf32>
    %cst_172 = arith.constant 0.949999988 : f32
    %361 = vector.broadcast %cst_172 : f32 to vector<8x32xf32>
    %362 = arith.mulf %361, %358 : vector<8x32xf32>
    %cst_173 = arith.constant 8.000000e-01 : f32
    %363 = vector.broadcast %cst_173 : f32 to vector<8x32xf32>
    %364 = arith.mulf %363, %349 : vector<8x32xf32>
    %365 = arith.addf %364, %360 : vector<8x32xf32>
    %366 = arith.addf %362, %365 : vector<8x32xf32>
    %cst_174 = arith.constant 5.000000e-01 : f32
    %367 = vector.broadcast %cst_174 : f32 to vector<8x32xf32>
    %368 = arith.cmpf ogt, %366, %367 : vector<8x32xf32>
    %cst_175 = arith.constant 1.000000e+00 : f32
    %cst_176 = arith.constant 0.000000e+00 : f32
    %369 = vector.broadcast %cst_175 : f32 to vector<8x32xf32>
    %370 = vector.broadcast %cst_176 : f32 to vector<8x32xf32>
    %371 = arith.select %368, %369, %370 : vector<8x32xi1>, vector<8x32xf32>
    %cst_177 = arith.constant 1.000000e+00 : f32
    %372 = vector.broadcast %cst_177 : f32 to vector<8x32xf32>
    %373 = arith.subf %372, %371 : vector<8x32xf32>
    %374 = arith.mulf %366, %373 : vector<8x32xf32>
    %c48_178 = arith.constant 48 : index
    %c0_179 = arith.constant 0 : index
    %375 = vector.load %arg6[%c48_178, %c0_179] : memref<128x32xf32, #tpu.memory_space<vmem>>, vector<8x32xf32>
    tpu.vector_store %arg6[%c48_178, %c0_179], %371 {strides = array<i32>} : memref<128x32xf32, #tpu.memory_space<vmem>>, vector<8x32xf32>,
    %376 = vector.extract_strided_slice %261 {offsets = [56, 0], sizes = [8, 32], strides = [1, 1]} : vector<128x32xf32> to vector<8x32xf32>
    %cst_180 = arith.constant 0.949999988 : f32
    %377 = vector.broadcast %cst_180 : f32 to vector<8x32xf32>
    %378 = arith.mulf %377, %374 : vector<8x32xf32>
    %cst_181 = arith.constant 8.000000e-01 : f32
    %379 = vector.broadcast %cst_181 : f32 to vector<8x32xf32>
    %380 = arith.mulf %379, %365 : vector<8x32xf32>
    %381 = arith.addf %380, %376 : vector<8x32xf32>
    %382 = arith.addf %378, %381 : vector<8x32xf32>
    %cst_182 = arith.constant 5.000000e-01 : f32
    %383 = vector.broadcast %cst_182 : f32 to vector<8x32xf32>
    %384 = arith.cmpf ogt, %382, %383 : vector<8x32xf32>
    %cst_183 = arith.constant 1.000000e+00 : f32
    %cst_184 = arith.constant 0.000000e+00 : f32
    %385 = vector.broadcast %cst_183 : f32 to vector<8x32xf32>
    %386 = vector.broadcast %cst_184 : f32 to vector<8x32xf32>
    %387 = arith.select %384, %385, %386 : vector<8x32xi1>, vector<8x32xf32>
    %cst_185 = arith.constant 1.000000e+00 : f32
    %388 = vector.broadcast %cst_185 : f32 to vector<8x32xf32>
    %389 = arith.subf %388, %387 : vector<8x32xf32>
    %390 = arith.mulf %382, %389 : vector<8x32xf32>
    %c56_186 = arith.constant 56 : index
    %c0_187 = arith.constant 0 : index
    %391 = vector.load %arg6[%c56_186, %c0_187] : memref<128x32xf32, #tpu.memory_space<vmem>>, vector<8x32xf32>
    tpu.vector_store %arg6[%c56_186, %c0_187], %387 {strides = array<i32>} : memref<128x32xf32, #tpu.memory_space<vmem>>, vector<8x32xf32>,
    %392 = vector.extract_strided_slice %261 {offsets = [64, 0], sizes = [8, 32], strides = [1, 1]} : vector<128x32xf32> to vector<8x32xf32>
    %cst_188 = arith.constant 0.949999988 : f32
    %393 = vector.broadcast %cst_188 : f32 to vector<8x32xf32>
    %394 = arith.mulf %393, %390 : vector<8x32xf32>
    %cst_189 = arith.constant 8.000000e-01 : f32
    %395 = vector.broadcast %cst_189 : f32 to vector<8x32xf32>
    %396 = arith.mulf %395, %381 : vector<8x32xf32>
    %397 = arith.addf %396, %392 : vector<8x32xf32>
    %398 = arith.addf %394, %397 : vector<8x32xf32>
    %cst_190 = arith.constant 5.000000e-01 : f32
    %399 = vector.broadcast %cst_190 : f32 to vector<8x32xf32>
    %400 = arith.cmpf ogt, %398, %399 : vector<8x32xf32>
    %cst_191 = arith.constant 1.000000e+00 : f32
    %cst_192 = arith.constant 0.000000e+00 : f32
    %401 = vector.broadcast %cst_191 : f32 to vector<8x32xf32>
    %402 = vector.broadcast %cst_192 : f32 to vector<8x32xf32>
    %403 = arith.select %400, %401, %402 : vector<8x32xi1>, vector<8x32xf32>
    %cst_193 = arith.constant 1.000000e+00 : f32
    %404 = vector.broadcast %cst_193 : f32 to vector<8x32xf32>
    %405 = arith.subf %404, %403 : vector<8x32xf32>
    %406 = arith.mulf %398, %405 : vector<8x32xf32>
    %c64_194 = arith.constant 64 : index
    %c0_195 = arith.constant 0 : index
    %407 = vector.load %arg6[%c64_194, %c0_195] : memref<128x32xf32, #tpu.memory_space<vmem>>, vector<8x32xf32>
    tpu.vector_store %arg6[%c64_194, %c0_195], %403 {strides = array<i32>} : memref<128x32xf32, #tpu.memory_space<vmem>>, vector<8x32xf32>,
    %408 = vector.extract_strided_slice %261 {offsets = [72, 0], sizes = [8, 32], strides = [1, 1]} : vector<128x32xf32> to vector<8x32xf32>
    %cst_196 = arith.constant 0.949999988 : f32
    %409 = vector.broadcast %cst_196 : f32 to vector<8x32xf32>
    %410 = arith.mulf %409, %406 : vector<8x32xf32>
    %cst_197 = arith.constant 8.000000e-01 : f32
    %411 = vector.broadcast %cst_197 : f32 to vector<8x32xf32>
    %412 = arith.mulf %411, %397 : vector<8x32xf32>
    %413 = arith.addf %412, %408 : vector<8x32xf32>
    %414 = arith.addf %410, %413 : vector<8x32xf32>
    %cst_198 = arith.constant 5.000000e-01 : f32
    %415 = vector.broadcast %cst_198 : f32 to vector<8x32xf32>
    %416 = arith.cmpf ogt, %414, %415 : vector<8x32xf32>
    %cst_199 = arith.constant 1.000000e+00 : f32
    %cst_200 = arith.constant 0.000000e+00 : f32
    %417 = vector.broadcast %cst_199 : f32 to vector<8x32xf32>
    %418 = vector.broadcast %cst_200 : f32 to vector<8x32xf32>
    %419 = arith.select %416, %417, %418 : vector<8x32xi1>, vector<8x32xf32>
    %cst_201 = arith.constant 1.000000e+00 : f32
    %420 = vector.broadcast %cst_201 : f32 to vector<8x32xf32>
    %421 = arith.subf %420, %419 : vector<8x32xf32>
    %422 = arith.mulf %414, %421 : vector<8x32xf32>
    %c72_202 = arith.constant 72 : index
    %c0_203 = arith.constant 0 : index
    %423 = vector.load %arg6[%c72_202, %c0_203] : memref<128x32xf32, #tpu.memory_space<vmem>>, vector<8x32xf32>
    tpu.vector_store %arg6[%c72_202, %c0_203], %419 {strides = array<i32>} : memref<128x32xf32, #tpu.memory_space<vmem>>, vector<8x32xf32>,
    %424 = vector.extract_strided_slice %261 {offsets = [80, 0], sizes = [8, 32], strides = [1, 1]} : vector<128x32xf32> to vector<8x32xf32>
    %cst_204 = arith.constant 0.949999988 : f32
    %425 = vector.broadcast %cst_204 : f32 to vector<8x32xf32>
    %426 = arith.mulf %425, %422 : vector<8x32xf32>
    %cst_205 = arith.constant 8.000000e-01 : f32
    %427 = vector.broadcast %cst_205 : f32 to vector<8x32xf32>
    %428 = arith.mulf %427, %413 : vector<8x32xf32>
    %429 = arith.addf %428, %424 : vector<8x32xf32>
    %430 = arith.addf %426, %429 : vector<8x32xf32>
    %cst_206 = arith.constant 5.000000e-01 : f32
    %431 = vector.broadcast %cst_206 : f32 to vector<8x32xf32>
    %432 = arith.cmpf ogt, %430, %431 : vector<8x32xf32>
    %cst_207 = arith.constant 1.000000e+00 : f32
    %cst_208 = arith.constant 0.000000e+00 : f32
    %433 = vector.broadcast %cst_207 : f32 to vector<8x32xf32>
    %434 = vector.broadcast %cst_208 : f32 to vector<8x32xf32>
    %435 = arith.select %432, %433, %434 : vector<8x32xi1>, vector<8x32xf32>
    %cst_209 = arith.constant 1.000000e+00 : f32
    %436 = vector.broadcast %cst_209 : f32 to vector<8x32xf32>
    %437 = arith.subf %436, %435 : vector<8x32xf32>
    %438 = arith.mulf %430, %437 : vector<8x32xf32>
    %c80_210 = arith.constant 80 : index
    %c0_211 = arith.constant 0 : index
    %439 = vector.load %arg6[%c80_210, %c0_211] : memref<128x32xf32, #tpu.memory_space<vmem>>, vector<8x32xf32>
    tpu.vector_store %arg6[%c80_210, %c0_211], %435 {strides = array<i32>} : memref<128x32xf32, #tpu.memory_space<vmem>>, vector<8x32xf32>,
    %440 = vector.extract_strided_slice %261 {offsets = [88, 0], sizes = [8, 32], strides = [1, 1]} : vector<128x32xf32> to vector<8x32xf32>
    %cst_212 = arith.constant 0.949999988 : f32
    %441 = vector.broadcast %cst_212 : f32 to vector<8x32xf32>
    %442 = arith.mulf %441, %438 : vector<8x32xf32>
    %cst_213 = arith.constant 8.000000e-01 : f32
    %443 = vector.broadcast %cst_213 : f32 to vector<8x32xf32>
    %444 = arith.mulf %443, %429 : vector<8x32xf32>
    %445 = arith.addf %444, %440 : vector<8x32xf32>
    %446 = arith.addf %442, %445 : vector<8x32xf32>
    %cst_214 = arith.constant 5.000000e-01 : f32
    %447 = vector.broadcast %cst_214 : f32 to vector<8x32xf32>
    %448 = arith.cmpf ogt, %446, %447 : vector<8x32xf32>
    %cst_215 = arith.constant 1.000000e+00 : f32
    %cst_216 = arith.constant 0.000000e+00 : f32
    %449 = vector.broadcast %cst_215 : f32 to vector<8x32xf32>
    %450 = vector.broadcast %cst_216 : f32 to vector<8x32xf32>
    %451 = arith.select %448, %449, %450 : vector<8x32xi1>, vector<8x32xf32>
    %cst_217 = arith.constant 1.000000e+00 : f32
    %452 = vector.broadcast %cst_217 : f32 to vector<8x32xf32>
    %453 = arith.subf %452, %451 : vector<8x32xf32>
    %454 = arith.mulf %446, %453 : vector<8x32xf32>
    %c88_218 = arith.constant 88 : index
    %c0_219 = arith.constant 0 : index
    %455 = vector.load %arg6[%c88_218, %c0_219] : memref<128x32xf32, #tpu.memory_space<vmem>>, vector<8x32xf32>
    tpu.vector_store %arg6[%c88_218, %c0_219], %451 {strides = array<i32>} : memref<128x32xf32, #tpu.memory_space<vmem>>, vector<8x32xf32>,
    %456 = vector.extract_strided_slice %261 {offsets = [96, 0], sizes = [8, 32], strides = [1, 1]} : vector<128x32xf32> to vector<8x32xf32>
    %cst_220 = arith.constant 0.949999988 : f32
    %457 = vector.broadcast %cst_220 : f32 to vector<8x32xf32>
    %458 = arith.mulf %457, %454 : vector<8x32xf32>
    %cst_221 = arith.constant 8.000000e-01 : f32
    %459 = vector.broadcast %cst_221 : f32 to vector<8x32xf32>
    %460 = arith.mulf %459, %445 : vector<8x32xf32>
    %461 = arith.addf %460, %456 : vector<8x32xf32>
    %462 = arith.addf %458, %461 : vector<8x32xf32>
    %cst_222 = arith.constant 5.000000e-01 : f32
    %463 = vector.broadcast %cst_222 : f32 to vector<8x32xf32>
    %464 = arith.cmpf ogt, %462, %463 : vector<8x32xf32>
    %cst_223 = arith.constant 1.000000e+00 : f32
    %cst_224 = arith.constant 0.000000e+00 : f32
    %465 = vector.broadcast %cst_223 : f32 to vector<8x32xf32>
    %466 = vector.broadcast %cst_224 : f32 to vector<8x32xf32>
    %467 = arith.select %464, %465, %466 : vector<8x32xi1>, vector<8x32xf32>
    %cst_225 = arith.constant 1.000000e+00 : f32
    %468 = vector.broadcast %cst_225 : f32 to vector<8x32xf32>
    %469 = arith.subf %468, %467 : vector<8x32xf32>
    %470 = arith.mulf %462, %469 : vector<8x32xf32>
    %c96_226 = arith.constant 96 : index
    %c0_227 = arith.constant 0 : index
    %471 = vector.load %arg6[%c96_226, %c0_227] : memref<128x32xf32, #tpu.memory_space<vmem>>, vector<8x32xf32>
    tpu.vector_store %arg6[%c96_226, %c0_227], %467 {strides = array<i32>} : memref<128x32xf32, #tpu.memory_space<vmem>>, vector<8x32xf32>,
    %472 = vector.extract_strided_slice %261 {offsets = [104, 0], sizes = [8, 32], strides = [1, 1]} : vector<128x32xf32> to vector<8x32xf32>
    %cst_228 = arith.constant 0.949999988 : f32
    %473 = vector.broadcast %cst_228 : f32 to vector<8x32xf32>
    %474 = arith.mulf %473, %470 : vector<8x32xf32>
    %cst_229 = arith.constant 8.000000e-01 : f32
    %475 = vector.broadcast %cst_229 : f32 to vector<8x32xf32>
    %476 = arith.mulf %475, %461 : vector<8x32xf32>
    %477 = arith.addf %476, %472 : vector<8x32xf32>
    %478 = arith.addf %474, %477 : vector<8x32xf32>
    %cst_230 = arith.constant 5.000000e-01 : f32
    %479 = vector.broadcast %cst_230 : f32 to vector<8x32xf32>
    %480 = arith.cmpf ogt, %478, %479 : vector<8x32xf32>
    %cst_231 = arith.constant 1.000000e+00 : f32
    %cst_232 = arith.constant 0.000000e+00 : f32
    %481 = vector.broadcast %cst_231 : f32 to vector<8x32xf32>
    %482 = vector.broadcast %cst_232 : f32 to vector<8x32xf32>
    %483 = arith.select %480, %481, %482 : vector<8x32xi1>, vector<8x32xf32>
    %cst_233 = arith.constant 1.000000e+00 : f32
    %484 = vector.broadcast %cst_233 : f32 to vector<8x32xf32>
    %485 = arith.subf %484, %483 : vector<8x32xf32>
    %486 = arith.mulf %478, %485 : vector<8x32xf32>
    %c104_234 = arith.constant 104 : index
    %c0_235 = arith.constant 0 : index
    %487 = vector.load %arg6[%c104_234, %c0_235] : memref<128x32xf32, #tpu.memory_space<vmem>>, vector<8x32xf32>
    tpu.vector_store %arg6[%c104_234, %c0_235], %483 {strides = array<i32>} : memref<128x32xf32, #tpu.memory_space<vmem>>, vector<8x32xf32>,
    %488 = vector.extract_strided_slice %261 {offsets = [112, 0], sizes = [8, 32], strides = [1, 1]} : vector<128x32xf32> to vector<8x32xf32>
    %cst_236 = arith.constant 0.949999988 : f32
    %489 = vector.broadcast %cst_236 : f32 to vector<8x32xf32>
    %490 = arith.mulf %489, %486 : vector<8x32xf32>
    %cst_237 = arith.constant 8.000000e-01 : f32
    %491 = vector.broadcast %cst_237 : f32 to vector<8x32xf32>
    %492 = arith.mulf %491, %477 : vector<8x32xf32>
    %493 = arith.addf %492, %488 : vector<8x32xf32>
    %494 = arith.addf %490, %493 : vector<8x32xf32>
    %cst_238 = arith.constant 5.000000e-01 : f32
    %495 = vector.broadcast %cst_238 : f32 to vector<8x32xf32>
    %496 = arith.cmpf ogt, %494, %495 : vector<8x32xf32>
    %cst_239 = arith.constant 1.000000e+00 : f32
    %cst_240 = arith.constant 0.000000e+00 : f32
    %497 = vector.broadcast %cst_239 : f32 to vector<8x32xf32>
    %498 = vector.broadcast %cst_240 : f32 to vector<8x32xf32>
    %499 = arith.select %496, %497, %498 : vector<8x32xi1>, vector<8x32xf32>
    %cst_241 = arith.constant 1.000000e+00 : f32
    %500 = vector.broadcast %cst_241 : f32 to vector<8x32xf32>
    %501 = arith.subf %500, %499 : vector<8x32xf32>
    %502 = arith.mulf %494, %501 : vector<8x32xf32>
    %c112_242 = arith.constant 112 : index
    %c0_243 = arith.constant 0 : index
    %503 = vector.load %arg6[%c112_242, %c0_243] : memref<128x32xf32, #tpu.memory_space<vmem>>, vector<8x32xf32>
    tpu.vector_store %arg6[%c112_242, %c0_243], %499 {strides = array<i32>} : memref<128x32xf32, #tpu.memory_space<vmem>>, vector<8x32xf32>,
    %504 = vector.extract_strided_slice %261 {offsets = [120, 0], sizes = [8, 32], strides = [1, 1]} : vector<128x32xf32> to vector<8x32xf32>
    %cst_244 = arith.constant 0.949999988 : f32
    %505 = vector.broadcast %cst_244 : f32 to vector<8x32xf32>
    %506 = arith.mulf %505, %502 : vector<8x32xf32>
    %cst_245 = arith.constant 8.000000e-01 : f32
    %507 = vector.broadcast %cst_245 : f32 to vector<8x32xf32>
    %508 = arith.mulf %507, %493 : vector<8x32xf32>
    %509 = arith.addf %508, %504 : vector<8x32xf32>
    %510 = arith.addf %506, %509 : vector<8x32xf32>
    %cst_246 = arith.constant 5.000000e-01 : f32
    %511 = vector.broadcast %cst_246 : f32 to vector<8x32xf32>
    %512 = arith.cmpf ogt, %510, %511 : vector<8x32xf32>
    %cst_247 = arith.constant 1.000000e+00 : f32
    %cst_248 = arith.constant 0.000000e+00 : f32
    %513 = vector.broadcast %cst_247 : f32 to vector<8x32xf32>
    %514 = vector.broadcast %cst_248 : f32 to vector<8x32xf32>
    %515 = arith.select %512, %513, %514 : vector<8x32xi1>, vector<8x32xf32>
    %c120_249 = arith.constant 120 : index
    %c0_250 = arith.constant 0 : index
    %516 = vector.load %arg6[%c120_249, %c0_250] : memref<128x32xf32, #tpu.memory_space<vmem>>, vector<8x32xf32>
    tpu.vector_store %arg6[%c120_249, %c0_250], %515 {strides = array<i32>} : memref<128x32xf32, #tpu.memory_space<vmem>>, vector<8x32xf32>,
    %c0_251 = arith.constant 0 : index
    %c0_252 = arith.constant 0 : index
    %517 = vector.load %arg6[%c0_251, %c0_252] : memref<128x32xf32, #tpu.memory_space<vmem>>, vector<128x32xf32>
    %518 = arith.truncf %517 : vector<128x32xf32> to vector<128x32xbf16>
    %c0_253 = arith.constant 0 : index
    %c0_254 = arith.constant 0 : index
    %519 = vector.load %arg3[%c0_253, %c0_254] : memref<32x8xbf16, #tpu.memory_space<vmem>>, vector<32x8xbf16>
    %cst_255 = arith.constant dense<0.000000e+00> : vector<128x8xf32>
    %520 = tpu.matmul %518, %519, %cst_255 {dimension_numbers = #tpu.dot_dimension_numbers<[1], [0], [0], [1], [0, 0, 1, 1], [], []>} : vector<128x32xbf16>, vector<32x8xbf16>, vector<128x8xf32> -> vector<128x8xf32>
    %cst_256 = arith.constant 0.000000e+00 : f32
    %521 = vector.broadcast %cst_256 : f32 to vector<8x8xf32>
    %cst_257 = arith.constant 0.000000e+00 : f32
    %522 = vector.broadcast %cst_257 : f32 to vector<8x8xf32>
    %cst_258 = arith.constant 0.000000e+00 : f32
    %523 = vector.broadcast %cst_258 : f32 to vector<8x8xf32>
    %524 = vector.extract_strided_slice %520 {offsets = [0, 0], sizes = [8, 8], strides = [1, 1]} : vector<128x8xf32> to vector<8x8xf32>
    %cst_259 = arith.constant 0.949999988 : f32
    %525 = vector.broadcast %cst_259 : f32 to vector<8x8xf32>
    %526 = arith.mulf %525, %521 : vector<8x8xf32>
    %cst_260 = arith.constant 8.000000e-01 : f32
    %527 = vector.broadcast %cst_260 : f32 to vector<8x8xf32>
    %528 = arith.mulf %527, %522 : vector<8x8xf32>
    %529 = arith.addf %528, %524 : vector<8x8xf32>
    %530 = arith.addf %526, %529 : vector<8x8xf32>
    %cst_261 = arith.constant 5.000000e-01 : f32
    %531 = vector.broadcast %cst_261 : f32 to vector<8x8xf32>
    %532 = arith.cmpf ogt, %530, %531 : vector<8x8xf32>
    %cst_262 = arith.constant 1.000000e+00 : f32
    %cst_263 = arith.constant 0.000000e+00 : f32
    %533 = vector.broadcast %cst_262 : f32 to vector<8x8xf32>
    %534 = vector.broadcast %cst_263 : f32 to vector<8x8xf32>
    %535 = arith.select %532, %533, %534 : vector<8x8xi1>, vector<8x8xf32>
    %cst_264 = arith.constant 1.000000e+00 : f32
    %536 = vector.broadcast %cst_264 : f32 to vector<8x8xf32>
    %537 = arith.subf %536, %535 : vector<8x8xf32>
    %538 = arith.mulf %530, %537 : vector<8x8xf32>
    %539 = arith.addf %523, %535 : vector<8x8xf32>
    %540 = vector.extract_strided_slice %520 {offsets = [8, 0], sizes = [8, 8], strides = [1, 1]} : vector<128x8xf32> to vector<8x8xf32>
    %cst_265 = arith.constant 0.949999988 : f32
    %541 = vector.broadcast %cst_265 : f32 to vector<8x8xf32>
    %542 = arith.mulf %541, %538 : vector<8x8xf32>
    %cst_266 = arith.constant 8.000000e-01 : f32
    %543 = vector.broadcast %cst_266 : f32 to vector<8x8xf32>
    %544 = arith.mulf %543, %529 : vector<8x8xf32>
    %545 = arith.addf %544, %540 : vector<8x8xf32>
    %546 = arith.addf %542, %545 : vector<8x8xf32>
    %cst_267 = arith.constant 5.000000e-01 : f32
    %547 = vector.broadcast %cst_267 : f32 to vector<8x8xf32>
    %548 = arith.cmpf ogt, %546, %547 : vector<8x8xf32>
    %cst_268 = arith.constant 1.000000e+00 : f32
    %cst_269 = arith.constant 0.000000e+00 : f32
    %549 = vector.broadcast %cst_268 : f32 to vector<8x8xf32>
    %550 = vector.broadcast %cst_269 : f32 to vector<8x8xf32>
    %551 = arith.select %548, %549, %550 : vector<8x8xi1>, vector<8x8xf32>
    %cst_270 = arith.constant 1.000000e+00 : f32
    %552 = vector.broadcast %cst_270 : f32 to vector<8x8xf32>
    %553 = arith.subf %552, %551 : vector<8x8xf32>
    %554 = arith.mulf %546, %553 : vector<8x8xf32>
    %555 = arith.addf %539, %551 : vector<8x8xf32>
    %556 = vector.extract_strided_slice %520 {offsets = [16, 0], sizes = [8, 8], strides = [1, 1]} : vector<128x8xf32> to vector<8x8xf32>
    %cst_271 = arith.constant 0.949999988 : f32
    %557 = vector.broadcast %cst_271 : f32 to vector<8x8xf32>
    %558 = arith.mulf %557, %554 : vector<8x8xf32>
    %cst_272 = arith.constant 8.000000e-01 : f32
    %559 = vector.broadcast %cst_272 : f32 to vector<8x8xf32>
    %560 = arith.mulf %559, %545 : vector<8x8xf32>
    %561 = arith.addf %560, %556 : vector<8x8xf32>
    %562 = arith.addf %558, %561 : vector<8x8xf32>
    %cst_273 = arith.constant 5.000000e-01 : f32
    %563 = vector.broadcast %cst_273 : f32 to vector<8x8xf32>
    %564 = arith.cmpf ogt, %562, %563 : vector<8x8xf32>
    %cst_274 = arith.constant 1.000000e+00 : f32
    %cst_275 = arith.constant 0.000000e+00 : f32
    %565 = vector.broadcast %cst_274 : f32 to vector<8x8xf32>
    %566 = vector.broadcast %cst_275 : f32 to vector<8x8xf32>
    %567 = arith.select %564, %565, %566 : vector<8x8xi1>, vector<8x8xf32>
    %cst_276 = arith.constant 1.000000e+00 : f32
    %568 = vector.broadcast %cst_276 : f32 to vector<8x8xf32>
    %569 = arith.subf %568, %567 : vector<8x8xf32>
    %570 = arith.mulf %562, %569 : vector<8x8xf32>
    %571 = arith.addf %555, %567 : vector<8x8xf32>
    %572 = vector.extract_strided_slice %520 {offsets = [24, 0], sizes = [8, 8], strides = [1, 1]} : vector<128x8xf32> to vector<8x8xf32>
    %cst_277 = arith.constant 0.949999988 : f32
    %573 = vector.broadcast %cst_277 : f32 to vector<8x8xf32>
    %574 = arith.mulf %573, %570 : vector<8x8xf32>
    %cst_278 = arith.constant 8.000000e-01 : f32
    %575 = vector.broadcast %cst_278 : f32 to vector<8x8xf32>
    %576 = arith.mulf %575, %561 : vector<8x8xf32>
    %577 = arith.addf %576, %572 : vector<8x8xf32>
    %578 = arith.addf %574, %577 : vector<8x8xf32>
    %cst_279 = arith.constant 5.000000e-01 : f32
    %579 = vector.broadcast %cst_279 : f32 to vector<8x8xf32>
    %580 = arith.cmpf ogt, %578, %579 : vector<8x8xf32>
    %cst_280 = arith.constant 1.000000e+00 : f32
    %cst_281 = arith.constant 0.000000e+00 : f32
    %581 = vector.broadcast %cst_280 : f32 to vector<8x8xf32>
    %582 = vector.broadcast %cst_281 : f32 to vector<8x8xf32>
    %583 = arith.select %580, %581, %582 : vector<8x8xi1>, vector<8x8xf32>
    %cst_282 = arith.constant 1.000000e+00 : f32
    %584 = vector.broadcast %cst_282 : f32 to vector<8x8xf32>
    %585 = arith.subf %584, %583 : vector<8x8xf32>
    %586 = arith.mulf %578, %585 : vector<8x8xf32>
    %587 = arith.addf %571, %583 : vector<8x8xf32>
    %588 = vector.extract_strided_slice %520 {offsets = [32, 0], sizes = [8, 8], strides = [1, 1]} : vector<128x8xf32> to vector<8x8xf32>
    %cst_283 = arith.constant 0.949999988 : f32
    %589 = vector.broadcast %cst_283 : f32 to vector<8x8xf32>
    %590 = arith.mulf %589, %586 : vector<8x8xf32>
    %cst_284 = arith.constant 8.000000e-01 : f32
    %591 = vector.broadcast %cst_284 : f32 to vector<8x8xf32>
    %592 = arith.mulf %591, %577 : vector<8x8xf32>
    %593 = arith.addf %592, %588 : vector<8x8xf32>
    %594 = arith.addf %590, %593 : vector<8x8xf32>
    %cst_285 = arith.constant 5.000000e-01 : f32
    %595 = vector.broadcast %cst_285 : f32 to vector<8x8xf32>
    %596 = arith.cmpf ogt, %594, %595 : vector<8x8xf32>
    %cst_286 = arith.constant 1.000000e+00 : f32
    %cst_287 = arith.constant 0.000000e+00 : f32
    %597 = vector.broadcast %cst_286 : f32 to vector<8x8xf32>
    %598 = vector.broadcast %cst_287 : f32 to vector<8x8xf32>
    %599 = arith.select %596, %597, %598 : vector<8x8xi1>, vector<8x8xf32>
    %cst_288 = arith.constant 1.000000e+00 : f32
    %600 = vector.broadcast %cst_288 : f32 to vector<8x8xf32>
    %601 = arith.subf %600, %599 : vector<8x8xf32>
    %602 = arith.mulf %594, %601 : vector<8x8xf32>
    %603 = arith.addf %587, %599 : vector<8x8xf32>
    %604 = vector.extract_strided_slice %520 {offsets = [40, 0], sizes = [8, 8], strides = [1, 1]} : vector<128x8xf32> to vector<8x8xf32>
    %cst_289 = arith.constant 0.949999988 : f32
    %605 = vector.broadcast %cst_289 : f32 to vector<8x8xf32>
    %606 = arith.mulf %605, %602 : vector<8x8xf32>
    %cst_290 = arith.constant 8.000000e-01 : f32
    %607 = vector.broadcast %cst_290 : f32 to vector<8x8xf32>
    %608 = arith.mulf %607, %593 : vector<8x8xf32>
    %609 = arith.addf %608, %604 : vector<8x8xf32>
    %610 = arith.addf %606, %609 : vector<8x8xf32>
    %cst_291 = arith.constant 5.000000e-01 : f32
    %611 = vector.broadcast %cst_291 : f32 to vector<8x8xf32>
    %612 = arith.cmpf ogt, %610, %611 : vector<8x8xf32>
    %cst_292 = arith.constant 1.000000e+00 : f32
    %cst_293 = arith.constant 0.000000e+00 : f32
    %613 = vector.broadcast %cst_292 : f32 to vector<8x8xf32>
    %614 = vector.broadcast %cst_293 : f32 to vector<8x8xf32>
    %615 = arith.select %612, %613, %614 : vector<8x8xi1>, vector<8x8xf32>
    %cst_294 = arith.constant 1.000000e+00 : f32
    %616 = vector.broadcast %cst_294 : f32 to vector<8x8xf32>
    %617 = arith.subf %616, %615 : vector<8x8xf32>
    %618 = arith.mulf %610, %617 : vector<8x8xf32>
    %619 = arith.addf %603, %615 : vector<8x8xf32>
    %620 = vector.extract_strided_slice %520 {offsets = [48, 0], sizes = [8, 8], strides = [1, 1]} : vector<128x8xf32> to vector<8x8xf32>
    %cst_295 = arith.constant 0.949999988 : f32
    %621 = vector.broadcast %cst_295 : f32 to vector<8x8xf32>
    %622 = arith.mulf %621, %618 : vector<8x8xf32>
    %cst_296 = arith.constant 8.000000e-01 : f32
    %623 = vector.broadcast %cst_296 : f32 to vector<8x8xf32>
    %624 = arith.mulf %623, %609 : vector<8x8xf32>
    %625 = arith.addf %624, %620 : vector<8x8xf32>
    %626 = arith.addf %622, %625 : vector<8x8xf32>
    %cst_297 = arith.constant 5.000000e-01 : f32
    %627 = vector.broadcast %cst_297 : f32 to vector<8x8xf32>
    %628 = arith.cmpf ogt, %626, %627 : vector<8x8xf32>
    %cst_298 = arith.constant 1.000000e+00 : f32
    %cst_299 = arith.constant 0.000000e+00 : f32
    %629 = vector.broadcast %cst_298 : f32 to vector<8x8xf32>
    %630 = vector.broadcast %cst_299 : f32 to vector<8x8xf32>
    %631 = arith.select %628, %629, %630 : vector<8x8xi1>, vector<8x8xf32>
    %cst_300 = arith.constant 1.000000e+00 : f32
    %632 = vector.broadcast %cst_300 : f32 to vector<8x8xf32>
    %633 = arith.subf %632, %631 : vector<8x8xf32>
    %634 = arith.mulf %626, %633 : vector<8x8xf32>
    %635 = arith.addf %619, %631 : vector<8x8xf32>
    %636 = vector.extract_strided_slice %520 {offsets = [56, 0], sizes = [8, 8], strides = [1, 1]} : vector<128x8xf32> to vector<8x8xf32>
    %cst_301 = arith.constant 0.949999988 : f32
    %637 = vector.broadcast %cst_301 : f32 to vector<8x8xf32>
    %638 = arith.mulf %637, %634 : vector<8x8xf32>
    %cst_302 = arith.constant 8.000000e-01 : f32
    %639 = vector.broadcast %cst_302 : f32 to vector<8x8xf32>
    %640 = arith.mulf %639, %625 : vector<8x8xf32>
    %641 = arith.addf %640, %636 : vector<8x8xf32>
    %642 = arith.addf %638, %641 : vector<8x8xf32>
    %cst_303 = arith.constant 5.000000e-01 : f32
    %643 = vector.broadcast %cst_303 : f32 to vector<8x8xf32>
    %644 = arith.cmpf ogt, %642, %643 : vector<8x8xf32>
    %cst_304 = arith.constant 1.000000e+00 : f32
    %cst_305 = arith.constant 0.000000e+00 : f32
    %645 = vector.broadcast %cst_304 : f32 to vector<8x8xf32>
    %646 = vector.broadcast %cst_305 : f32 to vector<8x8xf32>
    %647 = arith.select %644, %645, %646 : vector<8x8xi1>, vector<8x8xf32>
    %cst_306 = arith.constant 1.000000e+00 : f32
    %648 = vector.broadcast %cst_306 : f32 to vector<8x8xf32>
    %649 = arith.subf %648, %647 : vector<8x8xf32>
    %650 = arith.mulf %642, %649 : vector<8x8xf32>
    %651 = arith.addf %635, %647 : vector<8x8xf32>
    %652 = vector.extract_strided_slice %520 {offsets = [64, 0], sizes = [8, 8], strides = [1, 1]} : vector<128x8xf32> to vector<8x8xf32>
    %cst_307 = arith.constant 0.949999988 : f32
    %653 = vector.broadcast %cst_307 : f32 to vector<8x8xf32>
    %654 = arith.mulf %653, %650 : vector<8x8xf32>
    %cst_308 = arith.constant 8.000000e-01 : f32
    %655 = vector.broadcast %cst_308 : f32 to vector<8x8xf32>
    %656 = arith.mulf %655, %641 : vector<8x8xf32>
    %657 = arith.addf %656, %652 : vector<8x8xf32>
    %658 = arith.addf %654, %657 : vector<8x8xf32>
    %cst_309 = arith.constant 5.000000e-01 : f32
    %659 = vector.broadcast %cst_309 : f32 to vector<8x8xf32>
    %660 = arith.cmpf ogt, %658, %659 : vector<8x8xf32>
    %cst_310 = arith.constant 1.000000e+00 : f32
    %cst_311 = arith.constant 0.000000e+00 : f32
    %661 = vector.broadcast %cst_310 : f32 to vector<8x8xf32>
    %662 = vector.broadcast %cst_311 : f32 to vector<8x8xf32>
    %663 = arith.select %660, %661, %662 : vector<8x8xi1>, vector<8x8xf32>
    %cst_312 = arith.constant 1.000000e+00 : f32
    %664 = vector.broadcast %cst_312 : f32 to vector<8x8xf32>
    %665 = arith.subf %664, %663 : vector<8x8xf32>
    %666 = arith.mulf %658, %665 : vector<8x8xf32>
    %667 = arith.addf %651, %663 : vector<8x8xf32>
    %668 = vector.extract_strided_slice %520 {offsets = [72, 0], sizes = [8, 8], strides = [1, 1]} : vector<128x8xf32> to vector<8x8xf32>
    %cst_313 = arith.constant 0.949999988 : f32
    %669 = vector.broadcast %cst_313 : f32 to vector<8x8xf32>
    %670 = arith.mulf %669, %666 : vector<8x8xf32>
    %cst_314 = arith.constant 8.000000e-01 : f32
    %671 = vector.broadcast %cst_314 : f32 to vector<8x8xf32>
    %672 = arith.mulf %671, %657 : vector<8x8xf32>
    %673 = arith.addf %672, %668 : vector<8x8xf32>
    %674 = arith.addf %670, %673 : vector<8x8xf32>
    %cst_315 = arith.constant 5.000000e-01 : f32
    %675 = vector.broadcast %cst_315 : f32 to vector<8x8xf32>
    %676 = arith.cmpf ogt, %674, %675 : vector<8x8xf32>
    %cst_316 = arith.constant 1.000000e+00 : f32
    %cst_317 = arith.constant 0.000000e+00 : f32
    %677 = vector.broadcast %cst_316 : f32 to vector<8x8xf32>
    %678 = vector.broadcast %cst_317 : f32 to vector<8x8xf32>
    %679 = arith.select %676, %677, %678 : vector<8x8xi1>, vector<8x8xf32>
    %cst_318 = arith.constant 1.000000e+00 : f32
    %680 = vector.broadcast %cst_318 : f32 to vector<8x8xf32>
    %681 = arith.subf %680, %679 : vector<8x8xf32>
    %682 = arith.mulf %674, %681 : vector<8x8xf32>
    %683 = arith.addf %667, %679 : vector<8x8xf32>
    %684 = vector.extract_strided_slice %520 {offsets = [80, 0], sizes = [8, 8], strides = [1, 1]} : vector<128x8xf32> to vector<8x8xf32>
    %cst_319 = arith.constant 0.949999988 : f32
    %685 = vector.broadcast %cst_319 : f32 to vector<8x8xf32>
    %686 = arith.mulf %685, %682 : vector<8x8xf32>
    %cst_320 = arith.constant 8.000000e-01 : f32
    %687 = vector.broadcast %cst_320 : f32 to vector<8x8xf32>
    %688 = arith.mulf %687, %673 : vector<8x8xf32>
    %689 = arith.addf %688, %684 : vector<8x8xf32>
    %690 = arith.addf %686, %689 : vector<8x8xf32>
    %cst_321 = arith.constant 5.000000e-01 : f32
    %691 = vector.broadcast %cst_321 : f32 to vector<8x8xf32>
    %692 = arith.cmpf ogt, %690, %691 : vector<8x8xf32>
    %cst_322 = arith.constant 1.000000e+00 : f32
    %cst_323 = arith.constant 0.000000e+00 : f32
    %693 = vector.broadcast %cst_322 : f32 to vector<8x8xf32>
    %694 = vector.broadcast %cst_323 : f32 to vector<8x8xf32>
    %695 = arith.select %692, %693, %694 : vector<8x8xi1>, vector<8x8xf32>
    %cst_324 = arith.constant 1.000000e+00 : f32
    %696 = vector.broadcast %cst_324 : f32 to vector<8x8xf32>
    %697 = arith.subf %696, %695 : vector<8x8xf32>
    %698 = arith.mulf %690, %697 : vector<8x8xf32>
    %699 = arith.addf %683, %695 : vector<8x8xf32>
    %700 = vector.extract_strided_slice %520 {offsets = [88, 0], sizes = [8, 8], strides = [1, 1]} : vector<128x8xf32> to vector<8x8xf32>
    %cst_325 = arith.constant 0.949999988 : f32
    %701 = vector.broadcast %cst_325 : f32 to vector<8x8xf32>
    %702 = arith.mulf %701, %698 : vector<8x8xf32>
    %cst_326 = arith.constant 8.000000e-01 : f32
    %703 = vector.broadcast %cst_326 : f32 to vector<8x8xf32>
    %704 = arith.mulf %703, %689 : vector<8x8xf32>
    %705 = arith.addf %704, %700 : vector<8x8xf32>
    %706 = arith.addf %702, %705 : vector<8x8xf32>
    %cst_327 = arith.constant 5.000000e-01 : f32
    %707 = vector.broadcast %cst_327 : f32 to vector<8x8xf32>
    %708 = arith.cmpf ogt, %706, %707 : vector<8x8xf32>
    %cst_328 = arith.constant 1.000000e+00 : f32
    %cst_329 = arith.constant 0.000000e+00 : f32
    %709 = vector.broadcast %cst_328 : f32 to vector<8x8xf32>
    %710 = vector.broadcast %cst_329 : f32 to vector<8x8xf32>
    %711 = arith.select %708, %709, %710 : vector<8x8xi1>, vector<8x8xf32>
    %cst_330 = arith.constant 1.000000e+00 : f32
    %712 = vector.broadcast %cst_330 : f32 to vector<8x8xf32>
    %713 = arith.subf %712, %711 : vector<8x8xf32>
    %714 = arith.mulf %706, %713 : vector<8x8xf32>
    %715 = arith.addf %699, %711 : vector<8x8xf32>
    %716 = vector.extract_strided_slice %520 {offsets = [96, 0], sizes = [8, 8], strides = [1, 1]} : vector<128x8xf32> to vector<8x8xf32>
    %cst_331 = arith.constant 0.949999988 : f32
    %717 = vector.broadcast %cst_331 : f32 to vector<8x8xf32>
    %718 = arith.mulf %717, %714 : vector<8x8xf32>
    %cst_332 = arith.constant 8.000000e-01 : f32
    %719 = vector.broadcast %cst_332 : f32 to vector<8x8xf32>
    %720 = arith.mulf %719, %705 : vector<8x8xf32>
    %721 = arith.addf %720, %716 : vector<8x8xf32>
    %722 = arith.addf %718, %721 : vector<8x8xf32>
    %cst_333 = arith.constant 5.000000e-01 : f32
    %723 = vector.broadcast %cst_333 : f32 to vector<8x8xf32>
    %724 = arith.cmpf ogt, %722, %723 : vector<8x8xf32>
    %cst_334 = arith.constant 1.000000e+00 : f32
    %cst_335 = arith.constant 0.000000e+00 : f32
    %725 = vector.broadcast %cst_334 : f32 to vector<8x8xf32>
    %726 = vector.broadcast %cst_335 : f32 to vector<8x8xf32>
    %727 = arith.select %724, %725, %726 : vector<8x8xi1>, vector<8x8xf32>
    %cst_336 = arith.constant 1.000000e+00 : f32
    %728 = vector.broadcast %cst_336 : f32 to vector<8x8xf32>
    %729 = arith.subf %728, %727 : vector<8x8xf32>
    %730 = arith.mulf %722, %729 : vector<8x8xf32>
    %731 = arith.addf %715, %727 : vector<8x8xf32>
    %732 = vector.extract_strided_slice %520 {offsets = [104, 0], sizes = [8, 8], strides = [1, 1]} : vector<128x8xf32> to vector<8x8xf32>
    %cst_337 = arith.constant 0.949999988 : f32
    %733 = vector.broadcast %cst_337 : f32 to vector<8x8xf32>
    %734 = arith.mulf %733, %730 : vector<8x8xf32>
    %cst_338 = arith.constant 8.000000e-01 : f32
    %735 = vector.broadcast %cst_338 : f32 to vector<8x8xf32>
    %736 = arith.mulf %735, %721 : vector<8x8xf32>
    %737 = arith.addf %736, %732 : vector<8x8xf32>
    %738 = arith.addf %734, %737 : vector<8x8xf32>
    %cst_339 = arith.constant 5.000000e-01 : f32
    %739 = vector.broadcast %cst_339 : f32 to vector<8x8xf32>
    %740 = arith.cmpf ogt, %738, %739 : vector<8x8xf32>
    %cst_340 = arith.constant 1.000000e+00 : f32
    %cst_341 = arith.constant 0.000000e+00 : f32
    %741 = vector.broadcast %cst_340 : f32 to vector<8x8xf32>
    %742 = vector.broadcast %cst_341 : f32 to vector<8x8xf32>
    %743 = arith.select %740, %741, %742 : vector<8x8xi1>, vector<8x8xf32>
    %cst_342 = arith.constant 1.000000e+00 : f32
    %744 = vector.broadcast %cst_342 : f32 to vector<8x8xf32>
    %745 = arith.subf %744, %743 : vector<8x8xf32>
    %746 = arith.mulf %738, %745 : vector<8x8xf32>
    %747 = arith.addf %731, %743 : vector<8x8xf32>
    %748 = vector.extract_strided_slice %520 {offsets = [112, 0], sizes = [8, 8], strides = [1, 1]} : vector<128x8xf32> to vector<8x8xf32>
    %cst_343 = arith.constant 0.949999988 : f32
    %749 = vector.broadcast %cst_343 : f32 to vector<8x8xf32>
    %750 = arith.mulf %749, %746 : vector<8x8xf32>
    %cst_344 = arith.constant 8.000000e-01 : f32
    %751 = vector.broadcast %cst_344 : f32 to vector<8x8xf32>
    %752 = arith.mulf %751, %737 : vector<8x8xf32>
    %753 = arith.addf %752, %748 : vector<8x8xf32>
    %754 = arith.addf %750, %753 : vector<8x8xf32>
    %cst_345 = arith.constant 5.000000e-01 : f32
    %755 = vector.broadcast %cst_345 : f32 to vector<8x8xf32>
    %756 = arith.cmpf ogt, %754, %755 : vector<8x8xf32>
    %cst_346 = arith.constant 1.000000e+00 : f32
    %cst_347 = arith.constant 0.000000e+00 : f32
    %757 = vector.broadcast %cst_346 : f32 to vector<8x8xf32>
    %758 = vector.broadcast %cst_347 : f32 to vector<8x8xf32>
    %759 = arith.select %756, %757, %758 : vector<8x8xi1>, vector<8x8xf32>
    %cst_348 = arith.constant 1.000000e+00 : f32
    %760 = vector.broadcast %cst_348 : f32 to vector<8x8xf32>
    %761 = arith.subf %760, %759 : vector<8x8xf32>
    %762 = arith.mulf %754, %761 : vector<8x8xf32>
    %763 = arith.addf %747, %759 : vector<8x8xf32>
    %764 = vector.extract_strided_slice %520 {offsets = [120, 0], sizes = [8, 8], strides = [1, 1]} : vector<128x8xf32> to vector<8x8xf32>
    %cst_349 = arith.constant 0.949999988 : f32
    %765 = vector.broadcast %cst_349 : f32 to vector<8x8xf32>
    %766 = arith.mulf %765, %762 : vector<8x8xf32>
    %cst_350 = arith.constant 8.000000e-01 : f32
    %767 = vector.broadcast %cst_350 : f32 to vector<8x8xf32>
    %768 = arith.mulf %767, %753 : vector<8x8xf32>
    %769 = arith.addf %768, %764 : vector<8x8xf32>
    %770 = arith.addf %766, %769 : vector<8x8xf32>
    %cst_351 = arith.constant 5.000000e-01 : f32
    %771 = vector.broadcast %cst_351 : f32 to vector<8x8xf32>
    %772 = arith.cmpf ogt, %770, %771 : vector<8x8xf32>
    %cst_352 = arith.constant 1.000000e+00 : f32
    %cst_353 = arith.constant 0.000000e+00 : f32
    %773 = vector.broadcast %cst_352 : f32 to vector<8x8xf32>
    %774 = vector.broadcast %cst_353 : f32 to vector<8x8xf32>
    %775 = arith.select %772, %773, %774 : vector<8x8xi1>, vector<8x8xf32>
    %776 = arith.addf %763, %775 : vector<8x8xf32>
    %c0_354 = arith.constant 0 : index
    %c0_355 = arith.constant 0 : index
    %777 = vector.load %arg4[%c0_354, %c0_355] : memref<8x8xf32, #tpu.memory_space<vmem>>, vector<8x8xf32>
    tpu.vector_store %arg4[%c0_354, %c0_355], %776 {strides = array<i32>} : memref<8x8xf32, #tpu.memory_space<vmem>>, vector<8x8xf32>,
    return
  }
}

</mosaic_0001>

<bundles_post_ra>
// kernel: snn_forward.1
= control target key start
LH: loop header
LB: loop body
LE: loop exit
PB: predicated region body
PF: predicated region fallthrough
CT: control target
= control target key end

     0   :  { %vm106_vm0 = vcmask 523264   ;;  %vm186_vm1 = vcmask 261120   ;;  %v946_v15 = vmov 0.0   ;;  %s1127_s1 = inlined_call_operand.vmem [shape: bf16[64,32], index: 1, kind: input, shape index: {}]   ;;  %s1128_s0 = inlined_call_operand.vmem [shape: bf16[128,64], index: 0, kind: input, shape index: {}]   ;;  %s1129_s2 = inlined_call_operand.vmem [shape: bf16[32,32], index: 2, kind: input, shape index: {}]   ;;  %s1130_s3 = inlined_call_operand.vmem [shape: bf16[32,8], index: 3, kind: input, shape index: {}]   ;;  %s1131_s4 = inlined_call_operand.vmem [shape: f32[8,8], index: 4, kind: output, shape index: {}]  }
   0x1   :  { %v932_v0 = vld [vmem:[%s1127_s1 + $0x18] sm:$0xff]  ;;  %v931_v1 = vld [vmem:[%s1127_s1 + $0x10] sm:$0xff]  ;;  %v930_v2 = vld [vmem:[%s1127_s1 + $0x8] sm:$0xff] }
   0x2   :  { %135 = vmatpush.bf16.msra.mxu0 %v932_v0  ;;  %937 = vmatpush.bf16.msra.mxu3 %v932_v0  ;;  %v929_v3 = vld [vmem:[%s1127_s1] sm:$0xff]  ;;  %v922_v5 = vld [vmem:[%s1128_s0 + $0x8] sm:$0xff]  ;;  %v923_v6 = vld [vmem:[%s1128_s0 + $0x10] sm:$0xff] }
   0x3   :  { %v921_v4 = vld [vmem:[%s1128_s0] sm:$0xff]  ;;  %v927_v7 = vld [vmem:[%s1128_s0 + $0x30] sm:$0xff]  ;;  %v924_v8 = vld [vmem:[%s1128_s0 + $0x18] sm:$0xff] }
   0x4   :  { %v928_v9 = vld [vmem:[%s1128_s0 + $0x38] sm:$0xff]  ;;  %v925_v10 = vld [vmem:[%s1128_s0 + $0x20] sm:$0xff]  ;;  %v926_v11 = vld [vmem:[%s1128_s0 + $0x28] sm:$0xff] }
   0x5   :  { %v934_v12 = vld [vmem:[%s1129_s2 + $0x8] sm:$0xff]  ;;  %v933_v13 = vld [vmem:[%s1129_s2] sm:$0xff] }
   0x6   :  { %136 = vmatpush.bf16.msra.mxu0 %v931_v1  ;;  %938 = vmatpush.bf16.msra.mxu3 %v931_v1 }
   0x7   :  { %391 = vmatpush.bf16.msra.mxu1 %v934_v12 }
   0xa   :  { %137 = vmatpush.bf16.msra.mxu0 %v930_v2  ;;  %939 = vmatpush.bf16.msra.mxu3 %v930_v2 }
   0xb   :  { %392 = vmatpush.bf16.msra.mxu1 %v933_v13 }
   0xe   :  { %138 = vmatpush.bf16.msra.mxu0 %v929_v3  ;;  %940 = vmatpush.bf16.msra.mxu3 %v929_v3 }
  0x11   :  { %881 = vmatmul.msk.bf16.vlgmr.msra.gmra.mxu0 %vm106_vm0, %v921_v4  ;;  %887 = vmatmul.msk.bf16.vlgmr.msra.gmra.mxu3 %vm106_vm0, %v927_v7 }
  0x12   :  { %941 = vmatpush.bf16.msrb.mxu3 %v934_v12 }
  0x16   :  { %942 = vmatpush.bf16.msrb.mxu3 %v933_v13 }
  0x21   :  { %882 = vmatmul.msk.bf16.gmra.mxu0 %vm106_vm0, %v922_v5  ;;  %888 = vmatmul.msk.bf16.gmra.mxu3 %vm106_vm0, %v928_v9 }
  0x31   :  { %883 = vmatmul.msk.bf16.gmra.mxu0 %vm106_vm0, %v923_v6 }
  0x41   :  { %884 = vmatmul.msk.bf16.gmra.mxu0 %vm106_vm0, %v924_v8 }
  0x51   :  { %885 = vmatmul.msk.bf16.gmra.mxu0 %vm106_vm0, %v925_v10 }
  0x61   :  { %886 = vmatmul.msk.bf16.gmra.mxu0 %vm106_vm0, %v926_v11 }
  0x8e   :  { %v140_v14 = vpop.f32.mrf.mxu0 }
  0x8f   :  { %vm182_vm2 = vcmp.gt.f32.partialorder %v140_v14, 0.5  ;;  %v189_v19 = vmul.f32 0.8, %v140_v14 }
  0x90   :  { %v183_v16 = vsel %vm182_vm2, 1.0, %v946_v15 }
  0x91   :  { %v184_v17 = vsub.f32 1.0, %v183_v16  ;;  %187 = vst.msk [vmem:[#allocation2] sm:$0xff] %vm186_vm1, %v183_v16 }
  0x93   :  { %v185_v18 = vmul.f32 %v184_v17, %v140_v14 }
  0x95   :  { %v188_v21 = vmul.f32 0.95, %v185_v18 }
  0x96   :  { %v142_v20 = vpop.f32.mrf.mxu0 }
  0x97   :  { %v190_v22 = vadd.f32 %v189_v19, %v142_v20 }
  0x98   :  { %v321_v32 = vld [vmem:[#allocation2] sm:$0xff] }
  0x99   :  { %v191_v23 = vadd.f32 %v190_v22, %v188_v21  ;;  %v198_v28 = vmul.f32 0.8, %v190_v22 }
  0x9b   :  { %vm192_vm3 = vcmp.gt.f32.partialorder %v191_v23, 0.5 }
  0x9c   :  { %v193_v24 = vsel %vm192_vm3, 1.0, %v946_v15 }
  0x9d   :  { %v194_v25 = vsub.f32 1.0, %v193_v24  ;;  %196 = vst.msk [vmem:[#allocation2 + $0x8] sm:$0xff] %vm186_vm1, %v193_v24 }
  0x9e   :  { %v145_v26 = vpop.f32.mrf.mxu0 }
  0x9f   :  { %v195_v27 = vmul.f32 %v194_v25, %v191_v23  ;;  %v199_v30 = vadd.f32 %v198_v28, %v145_v26 }
  0xa1   :  { %v197_v29 = vmul.f32 0.95, %v195_v27  ;;  %v207_v39 = vmul.f32 0.8, %v199_v30 }
  0xa3   :  { %v200_v31 = vadd.f32 %v199_v30, %v197_v29 }
  0xa4   :  { %v322_v33 = vld [vmem:[#allocation2 + $0x8] sm:$0xff] }
  0xa5   :  { %vm201_vm4 = vcmp.gt.f32.partialorder %v200_v31, 0.5  ;;  %v337_v34 = vpack.c.bf16 %v322_v33, %v321_v32 }
  0xa6   :  { %v202_v35 = vsel %vm201_vm4, 1.0, %v946_v15  ;;  %v147_v37 = vpop.f32.mrf.mxu0 }
  0xa7   :  { %v203_v36 = vsub.f32 1.0, %v202_v35  ;;  %205 = vst.msk [vmem:[#allocation2 + $0x10] sm:$0xff] %vm186_vm1, %v202_v35  ;;  %897 = vmatmul.msk.bf16.vlgmr.msra.gmra.mxu1 %vm186_vm1, %v337_v34  ;;  %v208_v41 = vadd.f32 %v207_v39, %v147_v37 }
  0xa9   :  { %v204_v38 = vmul.f32 %v203_v36, %v200_v31  ;;  %v216_v47 = vmul.f32 0.8, %v208_v41 }
  0xab   :  { %v206_v40 = vmul.f32 0.95, %v204_v38 }
  0xad   :  { %v209_v42 = vadd.f32 %v208_v41, %v206_v40 }
  0xae   :  { %v150_v45 = vpop.f32.mrf.mxu0  ;;  %v323_v51 = vld [vmem:[#allocation2 + $0x10] sm:$0xff] }
  0xaf   :  { %vm210_vm5 = vcmp.gt.f32.partialorder %v209_v42, 0.5  ;;  %v217_v49 = vadd.f32 %v216_v47, %v150_v45 }
  0xb0   :  { %v211_v43 = vsel %vm210_vm5, 1.0, %v946_v15 }
  0xb1   :  { %v212_v44 = vsub.f32 1.0, %v211_v43  ;;  %214 = vst.msk [vmem:[#allocation2 + $0x18] sm:$0xff] %vm186_vm1, %v211_v43  ;;  %v225_v58 = vmul.f32 0.8, %v217_v49 }
  0xb3   :  { %v213_v46 = vmul.f32 %v212_v44, %v209_v42 }
  0xb5   :  { %v215_v48 = vmul.f32 0.95, %v213_v46 }
  0xb6   :  { %v152_v56 = vpop.f32.mrf.mxu0 }
  0xb7   :  { %v218_v50 = vadd.f32 %v217_v49, %v215_v48  ;;  %v226_v60 = vadd.f32 %v225_v58, %v152_v56 }
  0xb8   :  { %v324_v52 = vld [vmem:[#allocation2 + $0x18] sm:$0xff] }
  0xb9   :  { %vm219_vm6 = vcmp.gt.f32.partialorder %v218_v50, 0.5  ;;  %v338_v53 = vpack.c.bf16 %v324_v52, %v323_v51  ;;  %v234_v2 = vmul.f32 0.8, %v226_v60 }
  0xba   :  { %v220_v54 = vsel %vm219_vm6, 1.0, %v946_v15 }
  0xbb   :  { %v221_v55 = vsub.f32 1.0, %v220_v54  ;;  %223 = vst.msk [vmem:[#allocation2 + $0x20] sm:$0xff] %vm186_vm1, %v220_v54  ;;  %898 = vmatmul.msk.bf16.gmra.mxu1 %vm186_vm1, %v338_v53 }
  0xbd   :  { %v222_v57 = vmul.f32 %v221_v55, %v218_v50 }
  0xbe   :  { %v155_v0 = vpop.f32.mrf.mxu0 }
  0xbf   :  { %v224_v59 = vmul.f32 0.95, %v222_v57  ;;  %v235_v4 = vadd.f32 %v234_v2, %v155_v0 }
  0xc1   :  { %v227_v61 = vadd.f32 %v226_v60, %v224_v59  ;;  %v243_v13 = vmul.f32 0.8, %v235_v4  ;;  %v170_v59 = vpop.f32.mrf.mxu3 }
  0xc2   :  { %v325_v6 = vld [vmem:[#allocation2 + $0x20] sm:$0xff] }
  0xc3   :  { %vm228_vm7 = vcmp.gt.f32.partialorder %v227_v61, 0.5 }
  0xc4   :  { %v229_v62 = vsel %vm228_vm7, 1.0, %v946_v15 }
  0xc5   :  { %v230_v63 = vsub.f32 1.0, %v229_v62  ;;  %232 = vst.msk [vmem:[#allocation2 + $0x28] sm:$0xff] %vm186_vm1, %v229_v62 }
  0xc6   :  { %v157_v11 = vpop.f32.mrf.mxu0 }
  0xc7   :  { %v231_v1 = vmul.f32 %v230_v63, %v227_v61  ;;  %v244_v16 = vadd.f32 %v243_v13, %v157_v11 }
  0xc9   :  { %v233_v3 = vmul.f32 0.95, %v231_v1  ;;  %v252_v22 = vmul.f32 0.8, %v244_v16 }
  0xcb   :  { %v236_v5 = vadd.f32 %v235_v4, %v233_v3 }
  0xcc   :  { %v326_v7 = vld [vmem:[#allocation2 + $0x28] sm:$0xff] }
  0xcd   :  { %vm237_vm8 = vcmp.gt.f32.partialorder %v236_v5, 0.5  ;;  %v339_v8 = vpack.c.bf16 %v326_v7, %v325_v6  ;;  %v172_v6 = vpop.f32.mrf.mxu3 }
  0xce   :  { %v238_v9 = vsel %vm237_vm8, 1.0, %v946_v15  ;;  %v160_v20 = vpop.f32.mrf.mxu0 }
  0xcf   :  { %v239_v10 = vsub.f32 1.0, %v238_v9  ;;  %241 = vst.msk [vmem:[#allocation2 + $0x30] sm:$0xff] %vm186_vm1, %v238_v9  ;;  %899 = vmatmul.msk.bf16.gmra.mxu1 %vm186_vm1, %v339_v8  ;;  %v253_v24 = vadd.f32 %v252_v22, %v160_v20 }
  0xd1   :  { %v240_v12 = vmul.f32 %v239_v10, %v236_v5  ;;  %v261_v33 = vmul.f32 0.8, %v253_v24 }
  0xd3   :  { %v242_v14 = vmul.f32 0.95, %v240_v12  ;;  %v936_v12 = vld [vmem:[%s1130_s3 + $0x8] sm:$0xff] }
  0xd4   :  { %644 = vmatpush.bf16.msra.mxu2 %v936_v12  ;;  %943 = vmatpush.bf16.msra.mxu3 %v936_v12 }
  0xd5   :  { %v245_v17 = vadd.f32 %v244_v16, %v242_v14  ;;  %v175_v16 = vpop.f32.mrf.mxu3 }
  0xd6   :  { %v327_v26 = vld [vmem:[#allocation2 + $0x30] sm:$0xff]  ;;  %v162_v31 = vpop.f32.mrf.mxu0 }
  0xd7   :  { %vm246_vm9 = vcmp.gt.f32.partialorder %v245_v17, 0.5  ;;  %v262_v35 = vadd.f32 %v261_v33, %v162_v31 }
  0xd8   :  { %v247_v18 = vsel %vm246_vm9, 1.0, %v946_v15 }
  0xd9   :  { %v248_v19 = vsub.f32 1.0, %v247_v18  ;;  %250 = vst.msk [vmem:[#allocation2 + $0x38] sm:$0xff] %vm186_vm1, %v247_v18  ;;  %v270_v41 = vmul.f32 0.8, %v262_v35  ;;  %v935_v18 = vld [vmem:[%s1130_s3] sm:$0xff] }
  0xda   :  { %645 = vmatpush.bf16.msra.mxu2 %v935_v18  ;;  %944 = vmatpush.bf16.msra.mxu3 %v935_v18 }
  0xdb   :  { %v249_v21 = vmul.f32 %v248_v19, %v245_v17 }
  0xdd   :  { %v251_v23 = vmul.f32 0.95, %v249_v21 }
  0xde   :  { %v165_v39 = vpop.f32.mrf.mxu0 }
  0xdf   :  { %v254_v25 = vadd.f32 %v253_v24, %v251_v23  ;;  %v271_v43 = vadd.f32 %v270_v41, %v165_v39 }
  0xe0   :  { %v328_v27 = vld [vmem:[#allocation2 + $0x38] sm:$0xff] }
  0xe1   :  { %vm255_vm10 = vcmp.gt.f32.partialorder %v254_v25, 0.5  ;;  %v340_v28 = vpack.c.bf16 %v328_v27, %v327_v26  ;;  %v279_v52 = vmul.f32 0.8, %v271_v43 }
  0xe2   :  { %v256_v29 = vsel %vm255_vm10, 1.0, %v946_v15 }
  0xe3   :  { %v257_v30 = vsub.f32 1.0, %v256_v29  ;;  %259 = vst.msk [vmem:[#allocation2 + $0x40] sm:$0xff] %vm186_vm1, %v256_v29  ;;  %900 = vmatmul.msk.bf16.gmra.mxu1 %vm186_vm1, %v340_v28  ;;  %v177_v28 = vpop.f32.mrf.mxu3 }
  0xe5   :  { %v258_v32 = vmul.f32 %v257_v30, %v254_v25 }
  0xe6   :  { %v167_v50 = vpop.f32.mrf.mxu0 }
  0xe7   :  { %v260_v34 = vmul.f32 0.95, %v258_v32  ;;  %v280_v54 = vadd.f32 %v279_v52, %v167_v50 }
  0xe9   :  { %v263_v36 = vadd.f32 %v262_v35, %v260_v34  ;;  %v288_v58 = vmul.f32 0.8, %v280_v54 }
  0xea   :  { %v329_v45 = vld [vmem:[#allocation2 + $0x40] sm:$0xff] }
  0xeb   :  { %vm264_vm11 = vcmp.gt.f32.partialorder %v263_v36, 0.5  ;;  %v289_v62 = vadd.f32 %v288_v58, %v170_v59 }
  0xec   :  { %v265_v37 = vsel %vm264_vm11, 1.0, %v946_v15 }
  0xed   :  { %v266_v38 = vsub.f32 1.0, %v265_v37  ;;  %268 = vst.msk [vmem:[#allocation2 + $0x48] sm:$0xff] %vm186_vm1, %v265_v37  ;;  %v297_v5 = vmul.f32 0.8, %v289_v62 }
  0xef   :  { %v267_v40 = vmul.f32 %v266_v38, %v263_v36  ;;  %v298_v9 = vadd.f32 %v297_v5, %v172_v6 }
  0xf1   :  { %v269_v42 = vmul.f32 0.95, %v267_v40  ;;  %v306_v14 = vmul.f32 0.8, %v298_v9 }
  0xf3   :  { %v272_v44 = vadd.f32 %v271_v43, %v269_v42  ;;  %v307_v20 = vadd.f32 %v306_v14, %v175_v16 }
  0xf4   :  { %v330_v46 = vld [vmem:[#allocation2 + $0x48] sm:$0xff] }
  0xf5   :  { %vm273_vm12 = vcmp.gt.f32.partialorder %v272_v44, 0.5  ;;  %v341_v47 = vpack.c.bf16 %v330_v46, %v329_v45  ;;  %v315_v27 = vmul.f32 0.8, %v307_v20 }
  0xf6   :  { %v274_v48 = vsel %vm273_vm12, 1.0, %v946_v15 }
  0xf7   :  { %v275_v49 = vsub.f32 1.0, %v274_v48  ;;  %277 = vst.msk [vmem:[#allocation2 + $0x50] sm:$0xff] %vm186_vm1, %v274_v48  ;;  %901 = vmatmul.msk.bf16.gmra.mxu1 %vm186_vm1, %v341_v47  ;;  %v316_v31 = vadd.f32 %v315_v27, %v177_v28 }
  0xf9   :  { %v276_v51 = vmul.f32 %v275_v49, %v272_v44 }
  0xfb   :  { %v278_v53 = vmul.f32 0.95, %v276_v51 }
  0xfd   :  { %v281_v55 = vadd.f32 %v280_v54, %v278_v53 }
  0xfe   :  { %v331_v0 = vld [vmem:[#allocation2 + $0x50] sm:$0xff] }
  0xff   :  { %vm282_vm13 = vcmp.gt.f32.partialorder %v281_v55, 0.5 }
 0x100   :  { %v283_v56 = vsel %vm282_vm13, 1.0, %v946_v15 }
 0x101   :  { %v284_v57 = vsub.f32 1.0, %v283_v56  ;;  %286 = vst.msk [vmem:[#allocation2 + $0x58] sm:$0xff] %vm186_vm1, %v283_v56 }
 0x103   :  { %v285_v60 = vmul.f32 %v284_v57, %v281_v55 }
 0x105   :  { %v287_v61 = vmul.f32 0.95, %v285_v60 }
 0x107   :  { %v290_v63 = vadd.f32 %v289_v62, %v287_v61 }
 0x108   :  { %v332_v1 = vld [vmem:[#allocation2 + $0x58] sm:$0xff] }
 0x109   :  { %vm291_vm14 = vcmp.gt.f32.partialorder %v290_v63, 0.5  ;;  %v342_v2 = vpack.c.bf16 %v332_v1, %v331_v0 }
 0x10a   :  { %v292_v3 = vsel %vm291_vm14, 1.0, %v946_v15 }
 0x10b   :  { %v293_v4 = vsub.f32 1.0, %v292_v3  ;;  %295 = vst.msk [vmem:[#allocation2 + $0x60] sm:$0xff] %vm186_vm1, %v292_v3  ;;  %902 = vmatmul.msk.bf16.gmra.mxu1 %vm186_vm1, %v342_v2 }
 0x10d   :  { %v294_v7 = vmul.f32 %v293_v4, %v290_v63 }
 0x10f   :  { %v296_v8 = vmul.f32 0.95, %v294_v7 }
 0x111   :  { %v299_v10 = vadd.f32 %v298_v9, %v296_v8 }
 0x112   :  { %v333_v22 = vld [vmem:[#allocation2 + $0x60] sm:$0xff] }
 0x113   :  { %vm300_vm15 = vcmp.gt.f32.partialorder %v299_v10, 0.5 }
 0x114   :  { %v301_v11 = vsel %vm300_vm15, 1.0, %v946_v15 }
 0x115   :  { %v302_v13 = vsub.f32 1.0, %v301_v11  ;;  %304 = vst.msk [vmem:[#allocation2 + $0x68] sm:$0xff] %vm186_vm1, %v301_v11 }
 0x117   :  { %v303_v17 = vmul.f32 %v302_v13, %v299_v10 }
 0x119   :  { %v305_v19 = vmul.f32 0.95, %v303_v17 }
 0x11b   :  { %v308_v21 = vadd.f32 %v307_v20, %v305_v19 }
 0x11c   :  { %v334_v23 = vld [vmem:[#allocation2 + $0x68] sm:$0xff] }
 0x11d   :  { %vm309_vm0 = vcmp.gt.f32.partialorder %v308_v21, 0.5  ;;  %v343_v24 = vpack.c.bf16 %v334_v23, %v333_v22 }
 0x11e   :  { %v310_v25 = vsel %vm309_vm0, 1.0, %v946_v15 }
 0x11f   :  { %v311_v26 = vsub.f32 1.0, %v310_v25  ;;  %313 = vst.msk [vmem:[#allocation2 + $0x70] sm:$0xff] %vm186_vm1, %v310_v25  ;;  %903 = vmatmul.msk.bf16.gmra.mxu1 %vm186_vm1, %v343_v24 }
 0x121   :  { %v312_v29 = vmul.f32 %v311_v26, %v308_v21 }
 0x123   :  { %v314_v30 = vmul.f32 0.95, %v312_v29 }
 0x124   :  { %v394_v32 = vpop.f32.mrf.mxu1 }
 0x125   :  { %v317_v33 = vadd.f32 %v316_v31, %v314_v30  ;;  %vm436_vm2 = vcmp.gt.f32.partialorder %v394_v32, 0.5  ;;  %v442_v38 = vmul.f32 0.8, %v394_v32 }
 0x126   :  { %v437_v34 = vsel %vm436_vm2, 1.0, %v946_v15  ;;  %v335_v43 = vld [vmem:[#allocation2 + $0x70] sm:$0xff] }
 0x127   :  { %vm318_vm3 = vcmp.gt.f32.partialorder %v317_v33, 0.5  ;;  %v438_v35 = vsub.f32 1.0, %v437_v34  ;;  %440 = vst.msk [vmem:[#allocation3] sm:$0xff] %vm186_vm1, %v437_v34 }
 0x128   :  { %v319_v36 = vsel %vm318_vm3, 1.0, %v946_v15 }
 0x129   :  { %320 = vst.msk [vmem:[#allocation2 + $0x78] sm:$0xff] %vm186_vm1, %v319_v36  ;;  %v439_v37 = vmul.f32 %v438_v35, %v394_v32 }
 0x12b   :  { %v441_v40 = vmul.f32 0.95, %v439_v37 }
 0x12c   :  { %v396_v39 = vpop.f32.mrf.mxu1 }
 0x12d   :  { %v443_v41 = vadd.f32 %v442_v38, %v396_v39 }
 0x12e   :  { %v574_v53 = vld [vmem:[#allocation3] sm:$0xff] }
 0x12f   :  { %v444_v42 = vadd.f32 %v443_v41, %v441_v40  ;;  %v451_v49 = vmul.f32 0.8, %v443_v41 }
 0x130   :  { %v336_v44 = vld [vmem:[#allocation2 + $0x78] sm:$0xff] }
 0x131   :  { %vm445_vm4 = vcmp.gt.f32.partialorder %v444_v42, 0.5  ;;  %v344_v45 = vpack.c.bf16 %v336_v44, %v335_v43 }
 0x132   :  { %v446_v46 = vsel %vm445_vm4, 1.0, %v946_v15 }
 0x133   :  { %v447_v47 = vsub.f32 1.0, %v446_v46  ;;  %449 = vst.msk [vmem:[#allocation3 + $0x8] sm:$0xff] %vm186_vm1, %v446_v46  ;;  %904 = vmatmul.msk.bf16.vlgmr.msrb.gmra.mxu3 %vm186_vm1, %v344_v45 }
 0x135   :  { %v448_v48 = vmul.f32 %v447_v47, %v444_v42 }
 0x137   :  { %v450_v51 = vmul.f32 0.95, %v448_v48 }
 0x138   :  { %v399_v50 = vpop.f32.mrf.mxu1 }
 0x139   :  { %v452_v52 = vadd.f32 %v451_v49, %v399_v50 }
 0x13a   :  { %v575_v54 = vld [vmem:[#allocation3 + $0x8] sm:$0xff] }
 0x13b   :  { %v453_v55 = vadd.f32 %v452_v52, %v450_v51  ;;  %v590_v56 = vpack.c.bf16 %v575_v54, %v574_v53  ;;  %v460_v61 = vmul.f32 0.8, %v452_v52 }
 0x13d   :  { %vm454_vm5 = vcmp.gt.f32.partialorder %v453_v55, 0.5  ;;  %913 = vmatmul.msk.bf16.vlgmr.msra.gmra.mxu2 %vm186_vm1, %v590_v56 }
 0x13e   :  { %v455_v57 = vsel %vm454_vm5, 1.0, %v946_v15 }
 0x13f   :  { %v456_v58 = vsub.f32 1.0, %v455_v57  ;;  %458 = vst.msk [vmem:[#allocation3 + $0x10] sm:$0xff] %vm186_vm1, %v455_v57 }
 0x140   :  { %v401_v59 = vpop.f32.mrf.mxu1 }
 0x141   :  { %v457_v60 = vmul.f32 %v456_v58, %v453_v55  ;;  %v461_v63 = vadd.f32 %v460_v61, %v401_v59 }
 0x143   :  { %v459_v62 = vmul.f32 0.95, %v457_v60  ;;  %v469_v4 = vmul.f32 0.8, %v461_v63 }
 0x145   :  { %v462_v0 = vadd.f32 %v461_v63, %v459_v62 }
 0x146   :  { %v576_v9 = vld [vmem:[#allocation3 + $0x10] sm:$0xff] }
 0x147   :  { %vm463_vm6 = vcmp.gt.f32.partialorder %v462_v0, 0.5 }
 0x148   :  { %v464_v1 = vsel %vm463_vm6, 1.0, %v946_v15 }
 0x149   :  { %v465_v2 = vsub.f32 1.0, %v464_v1  ;;  %467 = vst.msk [vmem:[#allocation3 + $0x18] sm:$0xff] %vm186_vm1, %v464_v1 }
 0x14b   :  { %v466_v3 = vmul.f32 %v465_v2, %v462_v0 }
 0x14c   :  { %v404_v5 = vpop.f32.mrf.mxu1 }
 0x14d   :  { %v468_v6 = vmul.f32 0.95, %v466_v3  ;;  %v470_v7 = vadd.f32 %v469_v4, %v404_v5 }
 0x14f   :  { %v471_v8 = vadd.f32 %v470_v7, %v468_v6  ;;  %v478_v17 = vmul.f32 0.8, %v470_v7 }
 0x150   :  { %v577_v10 = vld [vmem:[#allocation3 + $0x18] sm:$0xff] }
 0x151   :  { %vm472_vm7 = vcmp.gt.f32.partialorder %v471_v8, 0.5  ;;  %v591_v11 = vpack.c.bf16 %v577_v10, %v576_v9 }
 0x152   :  { %v473_v12 = vsel %vm472_vm7, 1.0, %v946_v15 }
 0x153   :  { %v474_v13 = vsub.f32 1.0, %v473_v12  ;;  %476 = vst.msk [vmem:[#allocation3 + $0x20] sm:$0xff] %vm186_vm1, %v473_v12  ;;  %914 = vmatmul.msk.bf16.gmra.mxu2 %vm186_vm1, %v591_v11 }
 0x154   :  { %v406_v14 = vpop.f32.mrf.mxu1 }
 0x155   :  { %v475_v16 = vmul.f32 %v474_v13, %v471_v8  ;;  %v479_v19 = vadd.f32 %v478_v17, %v406_v14 }
 0x157   :  { %v477_v18 = vmul.f32 0.95, %v475_v16  ;;  %v487_v24 = vmul.f32 0.8, %v479_v19 }
 0x159   :  { %v480_v20 = vadd.f32 %v479_v19, %v477_v18 }
 0x15a   :  { %v578_v29 = vld [vmem:[#allocation3 + $0x20] sm:$0xff] }
 0x15b   :  { %vm481_vm8 = vcmp.gt.f32.partialorder %v480_v20, 0.5 }
 0x15c   :  { %v482_v21 = vsel %vm481_vm8, 1.0, %v946_v15 }
 0x15d   :  { %v483_v22 = vsub.f32 1.0, %v482_v21  ;;  %485 = vst.msk [vmem:[#allocation3 + $0x28] sm:$0xff] %vm186_vm1, %v482_v21 }
 0x15f   :  { %v484_v23 = vmul.f32 %v483_v22, %v480_v20 }
 0x160   :  { %v409_v25 = vpop.f32.mrf.mxu1 }
 0x161   :  { %v486_v26 = vmul.f32 0.95, %v484_v23  ;;  %v488_v27 = vadd.f32 %v487_v24, %v409_v25 }
 0x163   :  { %v489_v28 = vadd.f32 %v488_v27, %v486_v26  ;;  %v496_v36 = vmul.f32 0.8, %v488_v27 }
 0x164   :  { %v579_v30 = vld [vmem:[#allocation3 + $0x28] sm:$0xff] }
 0x165   :  { %vm490_vm9 = vcmp.gt.f32.partialorder %v489_v28, 0.5  ;;  %v592_v31 = vpack.c.bf16 %v579_v30, %v578_v29 }
 0x166   :  { %v491_v32 = vsel %vm490_vm9, 1.0, %v946_v15 }
 0x167   :  { %v492_v33 = vsub.f32 1.0, %v491_v32  ;;  %494 = vst.msk [vmem:[#allocation3 + $0x30] sm:$0xff] %vm186_vm1, %v491_v32  ;;  %915 = vmatmul.msk.bf16.gmra.mxu2 %vm186_vm1, %v592_v31 }
 0x168   :  { %v411_v34 = vpop.f32.mrf.mxu1 }
 0x169   :  { %v493_v35 = vmul.f32 %v492_v33, %v489_v28  ;;  %v497_v38 = vadd.f32 %v496_v36, %v411_v34 }
 0x16b   :  { %v495_v37 = vmul.f32 0.95, %v493_v35  ;;  %v505_v43 = vmul.f32 0.8, %v497_v38 }
 0x16d   :  { %v498_v39 = vadd.f32 %v497_v38, %v495_v37 }
 0x16e   :  { %v580_v48 = vld [vmem:[#allocation3 + $0x30] sm:$0xff] }
 0x16f   :  { %vm499_vm10 = vcmp.gt.f32.partialorder %v498_v39, 0.5 }
 0x170   :  { %v500_v40 = vsel %vm499_vm10, 1.0, %v946_v15 }
 0x171   :  { %v501_v41 = vsub.f32 1.0, %v500_v40  ;;  %503 = vst.msk [vmem:[#allocation3 + $0x38] sm:$0xff] %vm186_vm1, %v500_v40 }
 0x173   :  { %v502_v42 = vmul.f32 %v501_v41, %v498_v39 }
 0x174   :  { %v414_v44 = vpop.f32.mrf.mxu1 }
 0x175   :  { %v504_v45 = vmul.f32 0.95, %v502_v42  ;;  %v506_v46 = vadd.f32 %v505_v43, %v414_v44 }
 0x177   :  { %v507_v47 = vadd.f32 %v506_v46, %v504_v45  ;;  %v514_v55 = vmul.f32 0.8, %v506_v46 }
 0x178   :  { %v581_v49 = vld [vmem:[#allocation3 + $0x38] sm:$0xff] }
 0x179   :  { %vm508_vm11 = vcmp.gt.f32.partialorder %v507_v47, 0.5  ;;  %v593_v50 = vpack.c.bf16 %v581_v49, %v580_v48 }
 0x17a   :  { %v509_v51 = vsel %vm508_vm11, 1.0, %v946_v15 }
 0x17b   :  { %v510_v52 = vsub.f32 1.0, %v509_v51  ;;  %512 = vst.msk [vmem:[#allocation3 + $0x40] sm:$0xff] %vm186_vm1, %v509_v51  ;;  %916 = vmatmul.msk.bf16.gmra.mxu2 %vm186_vm1, %v593_v50 }
 0x17c   :  { %v416_v53 = vpop.f32.mrf.mxu1 }
 0x17d   :  { %v511_v54 = vmul.f32 %v510_v52, %v507_v47  ;;  %v515_v57 = vadd.f32 %v514_v55, %v416_v53 }
 0x17f   :  { %v513_v56 = vmul.f32 0.95, %v511_v54  ;;  %v523_v62 = vmul.f32 0.8, %v515_v57 }
 0x181   :  { %v516_v58 = vadd.f32 %v515_v57, %v513_v56 }
 0x182   :  { %v582_v3 = vld [vmem:[#allocation3 + $0x40] sm:$0xff] }
 0x183   :  { %vm517_vm12 = vcmp.gt.f32.partialorder %v516_v58, 0.5 }
 0x184   :  { %v518_v59 = vsel %vm517_vm12, 1.0, %v946_v15 }
 0x185   :  { %v519_v60 = vsub.f32 1.0, %v518_v59  ;;  %521 = vst.msk [vmem:[#allocation3 + $0x48] sm:$0xff] %vm186_vm1, %v518_v59 }
 0x187   :  { %v520_v61 = vmul.f32 %v519_v60, %v516_v58 }
 0x188   :  { %v419_v63 = vpop.f32.mrf.mxu1 }
 0x189   :  { %v522_v0 = vmul.f32 0.95, %v520_v61  ;;  %v524_v1 = vadd.f32 %v523_v62, %v419_v63 }
 0x18b   :  { %v525_v2 = vadd.f32 %v524_v1, %v522_v0  ;;  %v532_v10 = vmul.f32 0.8, %v524_v1 }
 0x18c   :  { %v583_v4 = vld [vmem:[#allocation3 + $0x48] sm:$0xff] }
 0x18d   :  { %vm526_vm13 = vcmp.gt.f32.partialorder %v525_v2, 0.5  ;;  %v594_v5 = vpack.c.bf16 %v583_v4, %v582_v3 }
 0x18e   :  { %v527_v6 = vsel %vm526_vm13, 1.0, %v946_v15 }
 0x18f   :  { %v528_v7 = vsub.f32 1.0, %v527_v6  ;;  %530 = vst.msk [vmem:[#allocation3 + $0x50] sm:$0xff] %vm186_vm1, %v527_v6  ;;  %917 = vmatmul.msk.bf16.gmra.mxu2 %vm186_vm1, %v594_v5 }
 0x190   :  { %v421_v8 = vpop.f32.mrf.mxu1 }
 0x191   :  { %v529_v9 = vmul.f32 %v528_v7, %v525_v2  ;;  %v533_v12 = vadd.f32 %v532_v10, %v421_v8 }
 0x193   :  { %v531_v11 = vmul.f32 0.95, %v529_v9  ;;  %v541_v18 = vmul.f32 0.8, %v533_v12 }
 0x195   :  { %v534_v13 = vadd.f32 %v533_v12, %v531_v11 }
 0x196   :  { %v584_v23 = vld [vmem:[#allocation3 + $0x50] sm:$0xff] }
 0x197   :  { %vm535_vm14 = vcmp.gt.f32.partialorder %v534_v13, 0.5 }
 0x198   :  { %v536_v14 = vsel %vm535_vm14, 1.0, %v946_v15 }
 0x199   :  { %v537_v16 = vsub.f32 1.0, %v536_v14  ;;  %539 = vst.msk [vmem:[#allocation3 + $0x58] sm:$0xff] %vm186_vm1, %v536_v14 }
 0x19b   :  { %v538_v17 = vmul.f32 %v537_v16, %v534_v13 }
 0x19c   :  { %v424_v19 = vpop.f32.mrf.mxu1 }
 0x19d   :  { %v540_v20 = vmul.f32 0.95, %v538_v17  ;;  %v542_v21 = vadd.f32 %v541_v18, %v424_v19 }
 0x19f   :  { %v543_v22 = vadd.f32 %v542_v21, %v540_v20  ;;  %v550_v30 = vmul.f32 0.8, %v542_v21 }
 0x1a0   :  { %v585_v24 = vld [vmem:[#allocation3 + $0x58] sm:$0xff] }
 0x1a1   :  { %vm544_vm15 = vcmp.gt.f32.partialorder %v543_v22, 0.5  ;;  %v595_v25 = vpack.c.bf16 %v585_v24, %v584_v23 }
 0x1a2   :  { %v545_v26 = vsel %vm544_vm15, 1.0, %v946_v15 }
 0x1a3   :  { %v546_v27 = vsub.f32 1.0, %v545_v26  ;;  %548 = vst.msk [vmem:[#allocation3 + $0x60] sm:$0xff] %vm186_vm1, %v545_v26  ;;  %918 = vmatmul.msk.bf16.gmra.mxu2 %vm186_vm1, %v595_v25 }
 0x1a4   :  { %v426_v28 = vpop.f32.mrf.mxu1 }
 0x1a5   :  { %v547_v29 = vmul.f32 %v546_v27, %v543_v22  ;;  %v551_v32 = vadd.f32 %v550_v30, %v426_v28 }
 0x1a7   :  { %v549_v31 = vmul.f32 0.95, %v547_v29  ;;  %v559_v39 = vmul.f32 0.8, %v551_v32 }
 0x1a9   :  { %v552_v33 = vadd.f32 %v551_v32, %v549_v31 }
 0x1aa   :  { %v586_v37 = vld [vmem:[#allocation3 + $0x60] sm:$0xff] }
 0x1ab   :  { %vm553_vm0 = vcmp.gt.f32.partialorder %v552_v33, 0.5 }
 0x1ac   :  { %v554_v34 = vsel %vm553_vm0, 1.0, %v946_v15 }
 0x1ad   :  { %557 = vst.msk [vmem:[#allocation3 + $0x68] sm:$0xff] %vm186_vm1, %v554_v34  ;;  %v555_v35 = vsub.f32 1.0, %v554_v34 }
 0x1af   :  { %v556_v36 = vmul.f32 %v555_v35, %v552_v33 }
 0x1b1   :  { %v558_v42 = vmul.f32 0.95, %v556_v36 }
 0x1b4   :  { %v587_v38 = vld [vmem:[#allocation3 + $0x68] sm:$0xff] }
 0x1b5   :  { %v596_v40 = vpack.c.bf16 %v587_v38, %v586_v37 }
 0x1b6   :  { %v429_v41 = vpop.f32.mrf.mxu3 }
 0x1b7   :  { %v560_v43 = vadd.f32 %v559_v39, %v429_v41  ;;  %919 = vmatmul.msk.bf16.gmra.mxu2 %vm186_vm1, %v596_v40 }
 0x1b9   :  { %v561_v44 = vadd.f32 %v560_v43, %v558_v42  ;;  %v568_v49 = vmul.f32 0.8, %v560_v43 }
 0x1bb   :  { %vm562_vm2 = vcmp.gt.f32.partialorder %v561_v44, 0.5 }
 0x1bc   :  { %v563_v45 = vsel %vm562_vm2, 1.0, %v946_v15 }
 0x1bd   :  { %v564_v46 = vsub.f32 1.0, %v563_v45  ;;  %566 = vst.msk [vmem:[#allocation3 + $0x70] sm:$0xff] %vm186_vm1, %v563_v45 }
 0x1be   :  { %v431_v47 = vpop.f32.mrf.mxu3 }
 0x1bf   :  { %v565_v48 = vmul.f32 %v564_v46, %v561_v44  ;;  %v569_v52 = vadd.f32 %v568_v49, %v431_v47 }
 0x1c0   :  { %v647_v50 = vpop.f32.mrf.mxu2 }
 0x1c1   :  { %v567_v51 = vmul.f32 0.95, %v565_v48  ;;  %vm689_vm3 = vcmp.gt.f32.partialorder %v647_v50, 0.5  ;;  %v695_v58 = vmul.f32 0.8, %v647_v50 }
 0x1c2   :  { %v690_v53 = vsel %vm689_vm3, 1.0, %v946_v15 }
 0x1c3   :  { %v570_v54 = vadd.f32 %v569_v52, %v567_v51  ;;  %v691_v55 = vsub.f32 1.0, %v690_v53 }
 0x1c4   :  { %v588_v0 = vld [vmem:[#allocation3 + $0x70] sm:$0xff] }
 0x1c5   :  { %vm571_vm4 = vcmp.gt.f32.partialorder %v570_v54, 0.5  ;;  %v692_v56 = vmul.f32 %v691_v55, %v647_v50 }
 0x1c6   :  { %v572_v57 = vsel %vm571_vm4, 1.0, %v946_v15  ;;  %vm827_vm4 = vcmask 64512  }
 0x1c7   :  { %573 = vst.msk [vmem:[#allocation3 + $0x78] sm:$0xff] %vm186_vm1, %v572_v57  ;;  %v694_v60 = vmul.f32 0.95, %v692_v56 }
 0x1c8   :  { %v649_v59 = vpop.f32.mrf.mxu2 }
 0x1c9   :  { %v696_v61 = vadd.f32 %v695_v58, %v649_v59 }
 0x1cb   :  { %v697_v62 = vadd.f32 %v696_v61, %v694_v60  ;;  %v704_v6 = vmul.f32 0.8, %v696_v61 }
 0x1cd   :  { %vm698_vm5 = vcmp.gt.f32.partialorder %v697_v62, 0.5 }
 0x1ce   :  { %v699_v63 = vsel %vm698_vm5, 1.0, %v946_v15  ;;  %v589_v1 = vld [vmem:[#allocation3 + $0x78] sm:$0xff] }
 0x1cf   :  { %v700_v2 = vsub.f32 1.0, %v699_v63  ;;  %v702_v3 = vadd.f32 %v699_v63, %v690_v53  ;;  %v597_v4 = vpack.c.bf16 %v589_v1, %v588_v0 }
 0x1d1   :  { %920 = vmatmul.msk.bf16.vlgmr.msra.gmra.mxu3 %vm186_vm1, %v597_v4  ;;  %v701_v5 = vmul.f32 %v700_v2, %v697_v62 }
 0x1d3   :  { %v703_v8 = vmul.f32 0.95, %v701_v5 }
 0x1d6   :  { %v652_v7 = vpop.f32.mrf.mxu2 }
 0x1d7   :  { %v705_v9 = vadd.f32 %v704_v6, %v652_v7 }
 0x1d9   :  { %v706_v10 = vadd.f32 %v705_v9, %v703_v8  ;;  %v713_v17 = vmul.f32 0.8, %v705_v9 }
 0x1db   :  { %vm707_vm6 = vcmp.gt.f32.partialorder %v706_v10, 0.5 }
 0x1dc   :  { %v708_v11 = vsel %vm707_vm6, 1.0, %v946_v15 }
 0x1dd   :  { %v709_v12 = vsub.f32 1.0, %v708_v11  ;;  %v711_v13 = vadd.f32 %v708_v11, %v702_v3 }
 0x1de   :  { %v654_v14 = vpop.f32.mrf.mxu2 }
 0x1df   :  { %v710_v16 = vmul.f32 %v709_v12, %v706_v10  ;;  %v714_v19 = vadd.f32 %v713_v17, %v654_v14 }
 0x1e1   :  { %v712_v18 = vmul.f32 0.95, %v710_v16  ;;  %v722_v25 = vmul.f32 0.8, %v714_v19 }
 0x1e3   :  { %v715_v20 = vadd.f32 %v714_v19, %v712_v18 }
 0x1e5   :  { %vm716_vm7 = vcmp.gt.f32.partialorder %v715_v20, 0.5 }
 0x1e6   :  { %v717_v21 = vsel %vm716_vm7, 1.0, %v946_v15 }
 0x1e7   :  { %v718_v22 = vsub.f32 1.0, %v717_v21  ;;  %v720_v23 = vadd.f32 %v717_v21, %v711_v13 }
 0x1e9   :  { %v719_v24 = vmul.f32 %v718_v22, %v715_v20 }
 0x1ea   :  { %v657_v26 = vpop.f32.mrf.mxu2 }
 0x1eb   :  { %v721_v27 = vmul.f32 0.95, %v719_v24  ;;  %v723_v28 = vadd.f32 %v722_v25, %v657_v26 }
 0x1ed   :  { %v724_v29 = vadd.f32 %v723_v28, %v721_v27  ;;  %v731_v35 = vmul.f32 0.8, %v723_v28 }
 0x1ef   :  { %vm725_vm1 = vcmp.gt.f32.partialorder %v724_v29, 0.5 }
 0x1f0   :  { %v726_v30 = vsel %vm725_vm1, 1.0, %v946_v15 }
 0x1f1   :  { %v727_v31 = vsub.f32 1.0, %v726_v30  ;;  %v729_v32 = vadd.f32 %v726_v30, %v720_v23 }
 0x1f2   :  { %v659_v33 = vpop.f32.mrf.mxu2 }
 0x1f3   :  { %v728_v34 = vmul.f32 %v727_v31, %v724_v29  ;;  %v732_v37 = vadd.f32 %v731_v35, %v659_v33 }
 0x1f5   :  { %v730_v36 = vmul.f32 0.95, %v728_v34  ;;  %v740_v43 = vmul.f32 0.8, %v732_v37 }
 0x1f7   :  { %v733_v38 = vadd.f32 %v732_v37, %v730_v36 }
 0x1f9   :  { %vm734_vm8 = vcmp.gt.f32.partialorder %v733_v38, 0.5 }
 0x1fa   :  { %v735_v39 = vsel %vm734_vm8, 1.0, %v946_v15 }
 0x1fb   :  { %v736_v40 = vsub.f32 1.0, %v735_v39  ;;  %v738_v41 = vadd.f32 %v735_v39, %v729_v32 }
 0x1fd   :  { %v737_v42 = vmul.f32 %v736_v40, %v733_v38 }
 0x1fe   :  { %v662_v44 = vpop.f32.mrf.mxu2 }
 0x1ff   :  { %v739_v45 = vmul.f32 0.95, %v737_v42  ;;  %v741_v46 = vadd.f32 %v740_v43, %v662_v44 }
 0x201   :  { %v742_v47 = vadd.f32 %v741_v46, %v739_v45  ;;  %v749_v53 = vmul.f32 0.8, %v741_v46 }
 0x203   :  { %vm743_vm9 = vcmp.gt.f32.partialorder %v742_v47, 0.5 }
 0x204   :  { %v744_v48 = vsel %vm743_vm9, 1.0, %v946_v15 }
 0x205   :  { %v745_v49 = vsub.f32 1.0, %v744_v48  ;;  %v747_v50 = vadd.f32 %v744_v48, %v738_v41 }
 0x206   :  { %v664_v51 = vpop.f32.mrf.mxu2 }
 0x207   :  { %v746_v52 = vmul.f32 %v745_v49, %v742_v47  ;;  %v750_v55 = vadd.f32 %v749_v53, %v664_v51 }
 0x209   :  { %v748_v54 = vmul.f32 0.95, %v746_v52  ;;  %v758_v61 = vmul.f32 0.8, %v750_v55 }
 0x20b   :  { %v751_v56 = vadd.f32 %v750_v55, %v748_v54 }
 0x20d   :  { %vm752_vm10 = vcmp.gt.f32.partialorder %v751_v56, 0.5 }
 0x20e   :  { %v753_v57 = vsel %vm752_vm10, 1.0, %v946_v15 }
 0x20f   :  { %v754_v58 = vsub.f32 1.0, %v753_v57  ;;  %v756_v59 = vadd.f32 %v753_v57, %v747_v50 }
 0x211   :  { %v755_v60 = vmul.f32 %v754_v58, %v751_v56 }
 0x212   :  { %v667_v62 = vpop.f32.mrf.mxu2 }
 0x213   :  { %v757_v63 = vmul.f32 0.95, %v755_v60  ;;  %v759_v0 = vadd.f32 %v758_v61, %v667_v62 }
 0x215   :  { %v760_v1 = vadd.f32 %v759_v0, %v757_v63  ;;  %v767_v6 = vmul.f32 0.8, %v759_v0 }
 0x217   :  { %vm761_vm11 = vcmp.gt.f32.partialorder %v760_v1, 0.5 }
 0x218   :  { %v762_v2 = vsel %vm761_vm11, 1.0, %v946_v15 }
 0x219   :  { %v763_v3 = vsub.f32 1.0, %v762_v2  ;;  %v765_v50 = vadd.f32 %v762_v2, %v756_v59 }
 0x21a   :  { %v669_v4 = vpop.f32.mrf.mxu2 }
 0x21b   :  { %v764_v5 = vmul.f32 %v763_v3, %v760_v1  ;;  %v768_v8 = vadd.f32 %v767_v6, %v669_v4 }
 0x21d   :  { %v766_v7 = vmul.f32 0.95, %v764_v5  ;;  %v776_v13 = vmul.f32 0.8, %v768_v8 }
 0x21f   :  { %v769_v9 = vadd.f32 %v768_v8, %v766_v7 }
 0x221   :  { %vm770_vm12 = vcmp.gt.f32.partialorder %v769_v9, 0.5 }
 0x222   :  { %v771_v10 = vsel %vm770_vm12, 1.0, %v946_v15 }
 0x223   :  { %v772_v11 = vsub.f32 1.0, %v771_v10  ;;  %v774_v52 = vadd.f32 %v771_v10, %v765_v50 }
 0x225   :  { %v773_v12 = vmul.f32 %v772_v11, %v769_v9 }
 0x226   :  { %v672_v14 = vpop.f32.mrf.mxu2 }
 0x227   :  { %v775_v16 = vmul.f32 0.95, %v773_v12  ;;  %v777_v17 = vadd.f32 %v776_v13, %v672_v14 }
 0x229   :  { %v778_v18 = vadd.f32 %v777_v17, %v775_v16  ;;  %v785_v23 = vmul.f32 0.8, %v777_v17 }
 0x22b   :  { %vm779_vm13 = vcmp.gt.f32.partialorder %v778_v18, 0.5 }
 0x22c   :  { %v780_v19 = vsel %vm779_vm13, 1.0, %v946_v15 }
 0x22d   :  { %v781_v20 = vsub.f32 1.0, %v780_v19  ;;  %v783_v54 = vadd.f32 %v780_v19, %v774_v52 }
 0x22e   :  { %v674_v21 = vpop.f32.mrf.mxu2 }
 0x22f   :  { %v782_v22 = vmul.f32 %v781_v20, %v778_v18  ;;  %v786_v25 = vadd.f32 %v785_v23, %v674_v21 }
 0x231   :  { %v784_v24 = vmul.f32 0.95, %v782_v22  ;;  %v794_v30 = vmul.f32 0.8, %v786_v25 }
 0x233   :  { %v787_v26 = vadd.f32 %v786_v25, %v784_v24 }
 0x235   :  { %vm788_vm14 = vcmp.gt.f32.partialorder %v787_v26, 0.5 }
 0x236   :  { %v789_v27 = vsel %vm788_vm14, 1.0, %v946_v15 }
 0x237   :  { %v790_v28 = vsub.f32 1.0, %v789_v27  ;;  %v792_v57 = vadd.f32 %v789_v27, %v783_v54 }
 0x239   :  { %v791_v29 = vmul.f32 %v790_v28, %v787_v26 }
 0x23a   :  { %v677_v31 = vpop.f32.mrf.mxu2 }
 0x23b   :  { %v793_v32 = vmul.f32 0.95, %v791_v29  ;;  %v795_v33 = vadd.f32 %v794_v30, %v677_v31 }
 0x23d   :  { %v796_v34 = vadd.f32 %v795_v33, %v793_v32  ;;  %v803_v39 = vmul.f32 0.8, %v795_v33 }
 0x23f   :  { %vm797_vm15 = vcmp.gt.f32.partialorder %v796_v34, 0.5 }
 0x240   :  { %v798_v35 = vsel %vm797_vm15, 1.0, %v946_v15 }
 0x241   :  { %v799_v36 = vsub.f32 1.0, %v798_v35  ;;  %v801_v61 = vadd.f32 %v798_v35, %v792_v57 }
 0x242   :  { %v679_v37 = vpop.f32.mrf.mxu2 }
 0x243   :  { %v800_v38 = vmul.f32 %v799_v36, %v796_v34  ;;  %v804_v41 = vadd.f32 %v803_v39, %v679_v37 }
 0x245   :  { %v802_v40 = vmul.f32 0.95, %v800_v38  ;;  %v812_v46 = vmul.f32 0.8, %v804_v41 }
 0x247   :  { %v805_v42 = vadd.f32 %v804_v41, %v802_v40 }
 0x249   :  { %vm806_vm0 = vcmp.gt.f32.partialorder %v805_v42, 0.5 }
 0x24a   :  { %v807_v43 = vsel %vm806_vm0, 1.0, %v946_v15 }
 0x24b   :  { %v808_v44 = vsub.f32 1.0, %v807_v43  ;;  %v810_v0 = vadd.f32 %v807_v43, %v801_v61 }
 0x24d   :  { %v809_v45 = vmul.f32 %v808_v44, %v805_v42 }
 0x24f   :  { %v811_v48 = vmul.f32 0.95, %v809_v45 }
 0x254   :  { %v682_v47 = vpop.f32.mrf.mxu3 }
 0x255   :  { %v813_v49 = vadd.f32 %v812_v46, %v682_v47 }
 0x257   :  { %v814_v51 = vadd.f32 %v813_v49, %v811_v48  ;;  %v821_v60 = vmul.f32 0.8, %v813_v49 }
 0x259   :  { %vm815_vm2 = vcmp.gt.f32.partialorder %v814_v51, 0.5 }
 0x25a   :  { %v816_v53 = vsel %vm815_vm2, 1.0, %v946_v15 }
 0x25b   :  { %v817_v55 = vsub.f32 1.0, %v816_v53  ;;  %v819_v3 = vadd.f32 %v816_v53, %v810_v0 }
 0x25c   :  { %v684_v56 = vpop.f32.mrf.mxu3 }
 0x25d   :  { %v818_v58 = vmul.f32 %v817_v55, %v814_v51  ;;  %v822_v63 = vadd.f32 %v821_v60, %v684_v56 }
 0x25f   :  { %v820_v62 = vmul.f32 0.95, %v818_v58 }
 0x261   :  { %v823_v1 = vadd.f32 %v822_v63, %v820_v62 }
 0x263   :  { %vm824_vm3 = vcmp.gt.f32.partialorder %v823_v1, 0.5 }
 0x264   :  { %v825_v59 = vsel %vm824_vm3, 1.0, %v946_v15 }
 0x265   :  { %v826_v2 = vadd.f32 %v825_v59, %v819_v3 }
 0x267   :  { %828 = vst.msk [vmem:[%s1131_s4] sm:$0xff] %vm827_vm4, %v826_v2 }

</bundles_post_ra>
